<compile_context>
chip_gen: v7x
topology: tpu7x:2x2x1
jax: 0.10.0
libtpu: 0.0.40
codegen_flags: <defaults>
</compile_context>

<pallas_src>
import functools

import jax
import jax.numpy as jnp
from jax.experimental import pallas as pl
from jax.experimental.pallas import tpu as pltpu

H1, H2, OUT = 1024, 256, 14
OUT_PAD = 128  # lane-dense output width (sliced back to OUT in the wrapper)


def _sigmoid(x_f32, exp_dtype):
    """sigmoid(x) = 1 / (1 + exp(-x)) built from EUP-only ops.

    exp() rides the EUP slot (bf16 rate on v6e/v7x when exp_dtype is bf16) and
    the approximate reciprocal also lowers to the EUP, so no precise-divide
    Newton iterations hit the VALU slots.
    """
    e = jnp.exp(-(x_f32.astype(exp_dtype))).astype(jnp.float32)
    return pl.reciprocal(1.0 + e, approx=True)


def _mlp_kernel(x_ref, w1_ref, b1_ref, w2_ref, b2_ref, w3_ref, b3_ref, o_ref,
                *, exp_dtype):
    # fc1 + sigmoid (dropout = identity at inference). bf16 MXU, f32 accumulate.
    h1 = jnp.dot(x_ref[...], w1_ref[...], preferred_element_type=jnp.float32)
    h1 = _sigmoid(h1 + b1_ref[...], exp_dtype)
    # fc2 + sigmoid
    h2 = jnp.dot(h1.astype(jnp.bfloat16), w2_ref[...],
                 preferred_element_type=jnp.float32)
    h2 = _sigmoid(h2 + b2_ref[...], exp_dtype)
    # fc3 + sigmoid (columns [OUT:OUT_PAD] carry zero weights/bias -> sliced off)
    h3 = jnp.dot(h2.astype(jnp.bfloat16), w3_ref[...],
                 preferred_element_type=jnp.float32)
    o_ref[...] = _sigmoid(h3 + b3_ref[...], exp_dtype).astype(o_ref.dtype)


def prepare_params(params):
    """One-time conversion of f32 nn.Linear params into kernel layout/dtypes.

    Hoists the per-call bf16 casts and the 14->128 lane pad out of the forward
    path so the steady-state call does zero weight preprocessing.
    Expects weights as (in, out), i.e. nn.Linear.weight.T, biases as (1, out).
    """
    w3 = jnp.zeros((H2, OUT_PAD), jnp.bfloat16).at[:, :OUT].set(
        params["w3"].astype(jnp.bfloat16))
    b3 = jnp.zeros((1, OUT_PAD), jnp.float32).at[:, :OUT].set(
        params["b3"].astype(jnp.float32))
    return {
        "w1": params["w1"].astype(jnp.bfloat16),
        "b1": params["b1"].astype(jnp.float32).reshape(1, H1),
        "w2": params["w2"].astype(jnp.bfloat16),
        "b2": params["b2"].astype(jnp.float32).reshape(1, H2),
        "w3": w3,
        "b3": b3,
    }


def _pick_batch_tile(B, tb_max=1024):
    if B <= 512:
        # Single block equal to the full batch: always layout-legal, no padding,
        # no wasted rows for tiny B (e.g. the B=8 test case).
        return B
    # >= 2 grid steps so the "parallel" axis can shard across both TensorCores
    # on v7x; multiple of 256 keeps the bf16 x block sublane-aligned.  A ragged
    # last block is handled by Pallas edge masking (no explicit pad of x).
    half = -(-B // 2)
    tb = -(-half // 256) * 256
    return min(tb_max, tb)


def _exp_dtype():
    kind = jax.devices()[0].device_kind.lower()
    # v6e/v7x EUP runs bf16 transcendentals ~2x f32 rate; v5e and older do not
    # have bf16 VPU/EUP, so keep the elementwise path in f32 there.
    legacy = any(tag in kind for tag in ("v2", "v3", "v4", "v5"))
    return jnp.float32 if legacy else jnp.bfloat16


def multi_label_classifier(x, prepared, *, tb_max=1024):
    """Fused forward pass.

    x: (B, input_size) float32
    prepared: output of prepare_params()
    returns: (B, 14) float32
    """
    B, D = x.shape
    assert prepared["w1"].shape == (D, H1)

    tb = _pick_batch_tile(B, tb_max)
    grid = (pl.cdiv(B, tb),)
    exp_dtype = _exp_dtype()

    xb = x.astype(jnp.bfloat16)

    rows = grid[0] * tb
    cost = pl.CostEstimate(
        flops=2 * rows * (D * H1 + H1 * H2 + H2 * OUT_PAD),
        transcendentals=2 * rows * (H1 + H2 + OUT_PAD),   # exp + reciprocal
        bytes_accessed=(rows * D * 2 + rows * OUT_PAD * 2
                        + (D * H1 + H1 * H2 + H2 * OUT_PAD) * 2
                        + (H1 + H2 + OUT_PAD) * 4),
    )

    kernel = functools.partial(_mlp_kernel, exp_dtype=exp_dtype)

    def call(single_buffer_weights):
        # Constant-index blocks are DMA'd once; Buffered(1) keeps only one VMEM
        # copy of each weight/bias (default double-buffering would waste 2x).
        resident = ({"pipeline_mode": pl.Buffered(1)}
                    if (single_buffer_weights and hasattr(pl, "Buffered"))
                    else {})
        return pl.pallas_call(
            kernel,
            out_shape=jax.ShapeDtypeStruct((B, OUT_PAD), jnp.bfloat16),
            grid=grid,
            in_specs=[
                pl.BlockSpec((tb, D), lambda i: (i, 0)),               # x streamed
                pl.BlockSpec((D, H1), lambda i: (0, 0), **resident),   # resident
                pl.BlockSpec((1, H1), lambda i: (0, 0), **resident),
                pl.BlockSpec((H1, H2), lambda i: (0, 0), **resident),
                pl.BlockSpec((1, H2), lambda i: (0, 0), **resident),
                pl.BlockSpec((H2, OUT_PAD), lambda i: (0, 0), **resident),
                pl.BlockSpec((1, OUT_PAD), lambda i: (0, 0), **resident),
            ],
            out_specs=pl.BlockSpec((tb, OUT_PAD), lambda i: (i, 0)),
            compiler_params=pltpu.CompilerParams(
                dimension_semantics=("parallel",),
                vmem_limit_bytes=56 << 20,   # leaves headroom on v7x (64 MiB phys)
            ),
            cost_estimate=cost,
        )(xb, prepared["w1"], prepared["b1"], prepared["w2"],
          prepared["b2"], prepared["w3"], prepared["b3"])

    try:
        out = call(True)
    except Exception:
        # Fallback: some Mosaic builds reject single-buffered resident blocks;
        # default double-buffering is functionally identical (just 2x weight VMEM).
        out = call(False)

    # Lane-pad columns [OUT:OUT_PAD] hold sigmoid(0)=0.5 -> sliced away here.
    return out[:B, :OUT].astype(jnp.float32)


def init_params(key, input_size):
    """Deterministic init matching nn.Linear default: U(-1/sqrt(fan_in), +)."""
    dims = [(input_size, H1), (H1, H2), (H2, OUT)]
    params = {}
    for i, (fan_in, fan_out) in enumerate(dims, start=1):
        key, kw, kb = jax.random.split(key, 3)
        bound = 1.0 / (fan_in ** 0.5)
        params[f"w{i}"] = jax.random.uniform(
            kw, (fan_in, fan_out), jnp.float32, -bound, bound)
        params[f"b{i}"] = jax.random.uniform(
            kb, (1, fan_out), jnp.float32, -bound, bound)
    return params


if __name__ == "__main__":
    key = jax.random.PRNGKey(0)
    k_x, k_p = jax.random.split(key)

    batch = 8
    input_size = 32
    x = jax.random.normal(k_x, (batch, input_size), jnp.float32)
    params = init_params(k_p, input_size)

    prepared = prepare_params(params)          # one-time weight conversion
    out = multi_label_classifier(x, prepared)
    out = jax.block_until_ready(out)

    # Plain-JAX f32 reference. Kernel uses bf16 matmuls / bf16 exp (v6e+) /
    # approx reciprocal / bf16 output store -> loose tolerance; sigmoid
    # compresses the error further.
    h = jax.nn.sigmoid(x @ params["w1"] + params["b1"])
    h = jax.nn.sigmoid(h @ params["w2"] + params["b2"])
    ref = jax.nn.sigmoid(h @ params["w3"] + params["b3"])
    assert out.shape == (batch, OUT)
    assert jnp.allclose(out, ref, atol=2e-2), "mismatch vs reference"

    print("KERNEL_OK")
</pallas_src>

<mosaic_0001>
module attributes {stable_mosaic.version = 11 : i64} {
  func.func @_mlp_kernel(%arg0: i32, %arg1: memref<8x32xbf16, #tpu.memory_space<vmem>>, %arg2: memref<32x1024xbf16, #tpu.memory_space<vmem>>, %arg3: memref<1x1024xf32, #tpu.memory_space<vmem>>, %arg4: memref<1024x256xbf16, #tpu.memory_space<vmem>>, %arg5: memref<1x256xf32, #tpu.memory_space<vmem>>, %arg6: memref<256x128xbf16, #tpu.memory_space<vmem>>, %arg7: memref<1x128xf32, #tpu.memory_space<vmem>>, %arg8: memref<8x128xbf16, #tpu.memory_space<vmem>>) attributes {dimension_semantics = [#tpu.dimension_semantics<parallel>], iteration_bounds = array<i64: 1>, scalar_prefetch = 0 : i64, scratch_operands = 0 : i64, tpu.core_type = #tpu.core_type<tc>, window_params = [{transform_indices = @transform_0, window_bounds = array<i64: 8, 32>}, {pipeline_mode = #tpu.pipeline_mode<synchronous>, transform_indices = @transform_1, window_bounds = array<i64: 32, 1024>}, {pipeline_mode = #tpu.pipeline_mode<synchronous>, transform_indices = @transform_2, window_bounds = array<i64: 1, 1024>}, {pipeline_mode = #tpu.pipeline_mode<synchronous>, transform_indices = @transform_3, window_bounds = array<i64: 1024, 256>}, {pipeline_mode = #tpu.pipeline_mode<synchronous>, transform_indices = @transform_4, window_bounds = array<i64: 1, 256>}, {pipeline_mode = #tpu.pipeline_mode<synchronous>, transform_indices = @transform_5, window_bounds = array<i64: 256, 128>}, {pipeline_mode = #tpu.pipeline_mode<synchronous>, transform_indices = @transform_6, window_bounds = array<i64: 1, 128>}, {transform_indices = @transform_7, window_bounds = array<i64: 8, 128>}]} {
    %c0 = arith.constant 0 : index
    %c0_0 = arith.constant 0 : index
    %0 = vector.load %arg1[%c0, %c0_0] : memref<8x32xbf16, #tpu.memory_space<vmem>>, vector<8x32xbf16>
    %c0_1 = arith.constant 0 : index
    %c0_2 = arith.constant 0 : index
    %1 = vector.load %arg2[%c0_1, %c0_2] : memref<32x1024xbf16, #tpu.memory_space<vmem>>, vector<32x1024xbf16>
    %cst = arith.constant dense<0.000000e+00> : vector<8x1024xf32>
    %2 = tpu.matmul %0, %1, %cst {dimension_numbers = #tpu.dot_dimension_numbers<[1], [0], [0], [1], [0, 0, 1, 1], [], []>} : vector<8x32xbf16>, vector<32x1024xbf16>, vector<8x1024xf32> -> vector<8x1024xf32>
    %c0_3 = arith.constant 0 : index
    %c0_4 = arith.constant 0 : index
    %3 = vector.load %arg3[%c0_3, %c0_4] : memref<1x1024xf32, #tpu.memory_space<vmem>>, vector<1x1024xf32>
    %4 = vector.broadcast %3 : vector<1x1024xf32> to vector<8x1024xf32>
    %5 = arith.addf %2, %4 : vector<8x1024xf32>
    %6 = arith.truncf %5 : vector<8x1024xf32> to vector<8x1024xbf16>
    %cst_5 = arith.constant 0.000000e+00 : bf16
    %7 = vector.broadcast %cst_5 : bf16 to vector<8x1024xbf16>
    %8 = arith.subf %7, %6 : vector<8x1024xbf16>
    %9 = math.exp %8 : vector<8x1024xbf16>
    %10 = arith.extf %9 : vector<8x1024xbf16> to vector<8x1024xf32>
    %cst_6 = arith.constant 1.000000e+00 : f32
    %11 = vector.broadcast %cst_6 : f32 to vector<8x1024xf32>
    %12 = arith.addf %11, %10 : vector<8x1024xf32>
    %13 = tpu.reciprocal %12 {approx = true} : vector<8x1024xf32> -> vector<8x1024xf32>
    %14 = arith.truncf %13 : vector<8x1024xf32> to vector<8x1024xbf16>
    %c0_7 = arith.constant 0 : index
    %c0_8 = arith.constant 0 : index
    %15 = vector.load %arg4[%c0_7, %c0_8] : memref<1024x256xbf16, #tpu.memory_space<vmem>>, vector<1024x256xbf16>
    %cst_9 = arith.constant dense<0.000000e+00> : vector<8x256xf32>
    %16 = tpu.matmul %14, %15, %cst_9 {dimension_numbers = #tpu.dot_dimension_numbers<[1], [0], [0], [1], [0, 0, 1, 1], [], []>} : vector<8x1024xbf16>, vector<1024x256xbf16>, vector<8x256xf32> -> vector<8x256xf32>
    %c0_10 = arith.constant 0 : index
    %c0_11 = arith.constant 0 : index
    %17 = vector.load %arg5[%c0_10, %c0_11] : memref<1x256xf32, #tpu.memory_space<vmem>>, vector<1x256xf32>
    %18 = vector.broadcast %17 : vector<1x256xf32> to vector<8x256xf32>
    %19 = arith.addf %16, %18 : vector<8x256xf32>
    %20 = arith.truncf %19 : vector<8x256xf32> to vector<8x256xbf16>
    %cst_12 = arith.constant 0.000000e+00 : bf16
    %21 = vector.broadcast %cst_12 : bf16 to vector<8x256xbf16>
    %22 = arith.subf %21, %20 : vector<8x256xbf16>
    %23 = math.exp %22 : vector<8x256xbf16>
    %24 = arith.extf %23 : vector<8x256xbf16> to vector<8x256xf32>
    %cst_13 = arith.constant 1.000000e+00 : f32
    %25 = vector.broadcast %cst_13 : f32 to vector<8x256xf32>
    %26 = arith.addf %25, %24 : vector<8x256xf32>
    %27 = tpu.reciprocal %26 {approx = true} : vector<8x256xf32> -> vector<8x256xf32>
    %28 = arith.truncf %27 : vector<8x256xf32> to vector<8x256xbf16>
    %c0_14 = arith.constant 0 : index
    %c0_15 = arith.constant 0 : index
    %29 = vector.load %arg6[%c0_14, %c0_15] : memref<256x128xbf16, #tpu.memory_space<vmem>>, vector<256x128xbf16>
    %cst_16 = arith.constant dense<0.000000e+00> : vector<8x128xf32>
    %30 = tpu.matmul %28, %29, %cst_16 {dimension_numbers = #tpu.dot_dimension_numbers<[1], [0], [0], [1], [0, 0, 1, 1], [], []>} : vector<8x256xbf16>, vector<256x128xbf16>, vector<8x128xf32> -> vector<8x128xf32>
    %c0_17 = arith.constant 0 : index
    %c0_18 = arith.constant 0 : index
    %31 = vector.load %arg7[%c0_17, %c0_18] : memref<1x128xf32, #tpu.memory_space<vmem>>, vector<1x128xf32>
    %32 = vector.broadcast %31 : vector<1x128xf32> to vector<8x128xf32>
    %33 = arith.addf %30, %32 : vector<8x128xf32>
    %34 = arith.truncf %33 : vector<8x128xf32> to vector<8x128xbf16>
    %cst_19 = arith.constant 0.000000e+00 : bf16
    %35 = vector.broadcast %cst_19 : bf16 to vector<8x128xbf16>
    %36 = arith.subf %35, %34 : vector<8x128xbf16>
    %37 = math.exp %36 : vector<8x128xbf16>
    %38 = arith.extf %37 : vector<8x128xbf16> to vector<8x128xf32>
    %cst_20 = arith.constant 1.000000e+00 : f32
    %39 = vector.broadcast %cst_20 : f32 to vector<8x128xf32>
    %40 = arith.addf %39, %38 : vector<8x128xf32>
    %41 = tpu.reciprocal %40 {approx = true} : vector<8x128xf32> -> vector<8x128xf32>
    %42 = arith.truncf %41 : vector<8x128xf32> to vector<8x128xbf16>
    %c0_21 = arith.constant 0 : index
    %c0_22 = arith.constant 0 : index
    %43 = vector.load %arg8[%c0_21, %c0_22] : memref<8x128xbf16, #tpu.memory_space<vmem>>, vector<8x128xbf16>
    tpu.vector_store %arg8[%c0_21, %c0_22], %42 {strides = array<i32>} : memref<8x128xbf16, #tpu.memory_space<vmem>>, vector<8x128xbf16>,
    return
  }
  func.func @transform_0(%arg0: i32) -> (i32, i32) {
    %c0_i32 = arith.constant 0 : i32
    %c0_i32_0 = arith.constant 0 : i32
    return %arg0, %c0_i32 : i32, i32
  }
  func.func @transform_1(%arg0: i32) -> (i32, i32) {
    %c0_i32 = arith.constant 0 : i32
    %c0_i32_0 = arith.constant 0 : i32
    %c0_i32_1 = arith.constant 0 : i32
    return %c0_i32, %c0_i32_0 : i32, i32
  }
  func.func @transform_2(%arg0: i32) -> (i32, i32) {
    %c0_i32 = arith.constant 0 : i32
    %c0_i32_0 = arith.constant 0 : i32
    %c0_i32_1 = arith.constant 0 : i32
    return %c0_i32, %c0_i32_0 : i32, i32
  }
  func.func @transform_3(%arg0: i32) -> (i32, i32) {
    %c0_i32 = arith.constant 0 : i32
    %c0_i32_0 = arith.constant 0 : i32
    %c0_i32_1 = arith.constant 0 : i32
    return %c0_i32, %c0_i32_0 : i32, i32
  }
  func.func @transform_4(%arg0: i32) -> (i32, i32) {
    %c0_i32 = arith.constant 0 : i32
    %c0_i32_0 = arith.constant 0 : i32
    %c0_i32_1 = arith.constant 0 : i32
    return %c0_i32, %c0_i32_0 : i32, i32
  }
  func.func @transform_5(%arg0: i32) -> (i32, i32) {
    %c0_i32 = arith.constant 0 : i32
    %c0_i32_0 = arith.constant 0 : i32
    %c0_i32_1 = arith.constant 0 : i32
    return %c0_i32, %c0_i32_0 : i32, i32
  }
  func.func @transform_6(%arg0: i32) -> (i32, i32) {
    %c0_i32 = arith.constant 0 : i32
    %c0_i32_0 = arith.constant 0 : i32
    %c0_i32_1 = arith.constant 0 : i32
    return %c0_i32, %c0_i32_0 : i32, i32
  }
  func.func @transform_7(%arg0: i32) -> (i32, i32) {
    %c0_i32 = arith.constant 0 : i32
    %c0_i32_0 = arith.constant 0 : i32
    return %arg0, %c0_i32 : i32, i32
  }
}

module attributes {stable_mosaic.version = 11 : i64} {
  func.func @_mlp_kernel(%arg0: i32, %arg1: memref<8x32xbf16, #tpu.memory_space<vmem>>, %arg2: memref<32x1024xbf16, #tpu.memory_space<vmem>>, %arg3: memref<1x1024xf32, #tpu.memory_space<vmem>>, %arg4: memref<1024x256xbf16, #tpu.memory_space<vmem>>, %arg5: memref<1x256xf32, #tpu.memory_space<vmem>>, %arg6: memref<256x128xbf16, #tpu.memory_space<vmem>>, %arg7: memref<1x128xf32, #tpu.memory_space<vmem>>, %arg8: memref<8x128xbf16, #tpu.memory_space<vmem>>) attributes {dimension_semantics = [#tpu.dimension_semantics<parallel>], iteration_bounds = array<i64: 1>, scalar_prefetch = 0 : i64, scratch_operands = 0 : i64, tpu.core_type = #tpu.core_type<tc>, window_params = [{transform_indices = @transform_0, window_bounds = array<i64: 8, 32>}, {pipeline_mode = #tpu.pipeline_mode<synchronous>, transform_indices = @transform_1, window_bounds = array<i64: 32, 1024>}, {pipeline_mode = #tpu.pipeline_mode<synchronous>, transform_indices = @transform_2, window_bounds = array<i64: 1, 1024>}, {pipeline_mode = #tpu.pipeline_mode<synchronous>, transform_indices = @transform_3, window_bounds = array<i64: 1024, 256>}, {pipeline_mode = #tpu.pipeline_mode<synchronous>, transform_indices = @transform_4, window_bounds = array<i64: 1, 256>}, {pipeline_mode = #tpu.pipeline_mode<synchronous>, transform_indices = @transform_5, window_bounds = array<i64: 256, 128>}, {pipeline_mode = #tpu.pipeline_mode<synchronous>, transform_indices = @transform_6, window_bounds = array<i64: 1, 128>}, {transform_indices = @transform_7, window_bounds = array<i64: 8, 128>}]} {
    %c0 = arith.constant 0 : index
    %c0_0 = arith.constant 0 : index
    %0 = vector.load %arg1[%c0, %c0_0] : memref<8x32xbf16, #tpu.memory_space<vmem>>, vector<8x32xbf16>
    %c0_1 = arith.constant 0 : index
    %c0_2 = arith.constant 0 : index
    %1 = vector.load %arg2[%c0_1, %c0_2] : memref<32x1024xbf16, #tpu.memory_space<vmem>>, vector<32x1024xbf16>
    %cst = arith.constant dense<0.000000e+00> : vector<8x1024xf32>
    %2 = tpu.matmul %0, %1, %cst {dimension_numbers = #tpu.dot_dimension_numbers<[1], [0], [0], [1], [0, 0, 1, 1], [], []>} : vector<8x32xbf16>, vector<32x1024xbf16>, vector<8x1024xf32> -> vector<8x1024xf32>
    %c0_3 = arith.constant 0 : index
    %c0_4 = arith.constant 0 : index
    %3 = vector.load %arg3[%c0_3, %c0_4] : memref<1x1024xf32, #tpu.memory_space<vmem>>, vector<1x1024xf32>
    %4 = vector.broadcast %3 : vector<1x1024xf32> to vector<8x1024xf32>
    %5 = arith.addf %2, %4 : vector<8x1024xf32>
    %6 = arith.truncf %5 : vector<8x1024xf32> to vector<8x1024xbf16>
    %cst_5 = arith.constant 0.000000e+00 : bf16
    %7 = vector.broadcast %cst_5 : bf16 to vector<8x1024xbf16>
    %8 = arith.subf %7, %6 : vector<8x1024xbf16>
    %9 = math.exp %8 : vector<8x1024xbf16>
    %10 = arith.extf %9 : vector<8x1024xbf16> to vector<8x1024xf32>
    %cst_6 = arith.constant 1.000000e+00 : f32
    %11 = vector.broadcast %cst_6 : f32 to vector<8x1024xf32>
    %12 = arith.addf %11, %10 : vector<8x1024xf32>
    %13 = tpu.reciprocal %12 {approx = true} : vector<8x1024xf32> -> vector<8x1024xf32>
    %14 = arith.truncf %13 : vector<8x1024xf32> to vector<8x1024xbf16>
    %c0_7 = arith.constant 0 : index
    %c0_8 = arith.constant 0 : index
    %15 = vector.load %arg4[%c0_7, %c0_8] : memref<1024x256xbf16, #tpu.memory_space<vmem>>, vector<1024x256xbf16>
    %cst_9 = arith.constant dense<0.000000e+00> : vector<8x256xf32>
    %16 = tpu.matmul %14, %15, %cst_9 {dimension_numbers = #tpu.dot_dimension_numbers<[1], [0], [0], [1], [0, 0, 1, 1], [], []>} : vector<8x1024xbf16>, vector<1024x256xbf16>, vector<8x256xf32> -> vector<8x256xf32>
    %c0_10 = arith.constant 0 : index
    %c0_11 = arith.constant 0 : index
    %17 = vector.load %arg5[%c0_10, %c0_11] : memref<1x256xf32, #tpu.memory_space<vmem>>, vector<1x256xf32>
    %18 = vector.broadcast %17 : vector<1x256xf32> to vector<8x256xf32>
    %19 = arith.addf %16, %18 : vector<8x256xf32>
    %20 = arith.truncf %19 : vector<8x256xf32> to vector<8x256xbf16>
    %cst_12 = arith.constant 0.000000e+00 : bf16
    %21 = vector.broadcast %cst_12 : bf16 to vector<8x256xbf16>
    %22 = arith.subf %21, %20 : vector<8x256xbf16>
    %23 = math.exp %22 : vector<8x256xbf16>
    %24 = arith.extf %23 : vector<8x256xbf16> to vector<8x256xf32>
    %cst_13 = arith.constant 1.000000e+00 : f32
    %25 = vector.broadcast %cst_13 : f32 to vector<8x256xf32>
    %26 = arith.addf %25, %24 : vector<8x256xf32>
    %27 = tpu.reciprocal %26 {approx = true} : vector<8x256xf32> -> vector<8x256xf32>
    %28 = arith.truncf %27 : vector<8x256xf32> to vector<8x256xbf16>
    %c0_14 = arith.constant 0 : index
    %c0_15 = arith.constant 0 : index
    %29 = vector.load %arg6[%c0_14, %c0_15] : memref<256x128xbf16, #tpu.memory_space<vmem>>, vector<256x128xbf16>
    %cst_16 = arith.constant dense<0.000000e+00> : vector<8x128xf32>
    %30 = tpu.matmul %28, %29, %cst_16 {dimension_numbers = #tpu.dot_dimension_numbers<[1], [0], [0], [1], [0, 0, 1, 1], [], []>} : vector<8x256xbf16>, vector<256x128xbf16>, vector<8x128xf32> -> vector<8x128xf32>
    %c0_17 = arith.constant 0 : index
    %c0_18 = arith.constant 0 : index
    %31 = vector.load %arg7[%c0_17, %c0_18] : memref<1x128xf32, #tpu.memory_space<vmem>>, vector<1x128xf32>
    %32 = vector.broadcast %31 : vector<1x128xf32> to vector<8x128xf32>
    %33 = arith.addf %30, %32 : vector<8x128xf32>
    %34 = arith.truncf %33 : vector<8x128xf32> to vector<8x128xbf16>
    %cst_19 = arith.constant 0.000000e+00 : bf16
    %35 = vector.broadcast %cst_19 : bf16 to vector<8x128xbf16>
    %36 = arith.subf %35, %34 : vector<8x128xbf16>
    %37 = math.exp %36 : vector<8x128xbf16>
    %38 = arith.extf %37 : vector<8x128xbf16> to vector<8x128xf32>
    %cst_20 = arith.constant 1.000000e+00 : f32
    %39 = vector.broadcast %cst_20 : f32 to vector<8x128xf32>
    %40 = arith.addf %39, %38 : vector<8x128xf32>
    %41 = tpu.reciprocal %40 {approx = true} : vector<8x128xf32> -> vector<8x128xf32>
    %42 = arith.truncf %41 : vector<8x128xf32> to vector<8x128xbf16>
    %c0_21 = arith.constant 0 : index
    %c0_22 = arith.constant 0 : index
    %43 = vector.load %arg8[%c0_21, %c0_22] : memref<8x128xbf16, #tpu.memory_space<vmem>>, vector<8x128xbf16>
    tpu.vector_store %arg8[%c0_21, %c0_22], %42 {strides = array<i32>} : memref<8x128xbf16, #tpu.memory_space<vmem>>, vector<8x128xbf16>,
    return
  }
  func.func @transform_0(%arg0: i32) -> (i32, i32) {
    %c0_i32 = arith.constant 0 : i32
    %c0_i32_0 = arith.constant 0 : i32
    return %arg0, %c0_i32 : i32, i32
  }
  func.func @transform_1(%arg0: i32) -> (i32, i32) {
    %c0_i32 = arith.constant 0 : i32
    %c0_i32_0 = arith.constant 0 : i32
    %c0_i32_1 = arith.constant 0 : i32
    return %c0_i32, %c0_i32_0 : i32, i32
  }
  func.func @transform_2(%arg0: i32) -> (i32, i32) {
    %c0_i32 = arith.constant 0 : i32
    %c0_i32_0 = arith.constant 0 : i32
    %c0_i32_1 = arith.constant 0 : i32
    return %c0_i32, %c0_i32_0 : i32, i32
  }
  func.func @transform_3(%arg0: i32) -> (i32, i32) {
    %c0_i32 = arith.constant 0 : i32
    %c0_i32_0 = arith.constant 0 : i32
    %c0_i32_1 = arith.constant 0 : i32
    return %c0_i32, %c0_i32_0 : i32, i32
  }
  func.func @transform_4(%arg0: i32) -> (i32, i32) {
    %c0_i32 = arith.constant 0 : i32
    %c0_i32_0 = arith.constant 0 : i32
    %c0_i32_1 = arith.constant 0 : i32
    return %c0_i32, %c0_i32_0 : i32, i32
  }
  func.func @transform_5(%arg0: i32) -> (i32, i32) {
    %c0_i32 = arith.constant 0 : i32
    %c0_i32_0 = arith.constant 0 : i32
    %c0_i32_1 = arith.constant 0 : i32
    return %c0_i32, %c0_i32_0 : i32, i32
  }
  func.func @transform_6(%arg0: i32) -> (i32, i32) {
    %c0_i32 = arith.constant 0 : i32
    %c0_i32_0 = arith.constant 0 : i32
    %c0_i32_1 = arith.constant 0 : i32
    return %c0_i32, %c0_i32_0 : i32, i32
  }
  func.func @transform_7(%arg0: i32) -> (i32, i32) {
    %c0_i32 = arith.constant 0 : i32
    %c0_i32_0 = arith.constant 0 : i32
    return %arg0, %c0_i32 : i32, i32
  }
}

</mosaic_0001>

<bundles_post_ra>
// kernel: tpu_custom_call.1
= control target key start
LH: loop header
LB: loop body
LE: loop exit
PB: predicated region body
PF: predicated region fallthrough
CT: control target
= control target key end

     0   :  { %12 = vsyncpa [#allocation3], 0  ;;  %s2418_s0 = inlined_call_operand.hbm [shape: bf16[8,32], index: 0, kind: input, shape index: {}]   ;;  %s2419_s1 = inlined_call_operand.hbm [shape: bf16[32,1024], index: 1, kind: input, shape index: {}]   ;;  %s2420_s2 = inlined_call_operand.hbm [shape: f32[1,1024], index: 2, kind: input, shape index: {}]   ;;  %s2421_s3 = inlined_call_operand.hbm [shape: bf16[1024,256], index: 3, kind: input, shape index: {}]   ;;  %s2422_s4 = inlined_call_operand.vmem [shape: f32[1,256], index: 4, kind: input, shape index: {}]   ;;  %s2423_s5 = inlined_call_operand.hbm [shape: bf16[256,128], index: 5, kind: input, shape index: {}]   ;;  %s2424_s6 = inlined_call_operand.vmem [shape: f32[1,128], index: 6, kind: input, shape index: {}]   ;;  %s2425_s7 = inlined_call_operand.hbm [shape: bf16[8,128], index: 7, kind: output, shape index: {}]  }
   0x1   :  { %13 = vsyncpa [#allocation6], 0 }
   0x2   :  { %14 = vsyncpa [#allocation9], 0 }
   0x3   :  { %15 = vsyncpa [#allocation4], 0  ;;  %s2239_s24 = smov [#allocation5]   ;;  %s2099_s28 = scalar_lea.hbm %s2419_s1, 2048 }
   0x4   :  { %s31_s25 = sshll.u32 %s2239_s24, 4  ;;  %p2100_p0 = scmp.ne.s32.totalorder %s2419_s1, %s2099_s28  ;;  %s32_s25 = int_to_ptr.vmem [resolvable:$true] %s31_s25 }
   0x5   :  { %p2103_p1 = scmp.lt.u32.totalorder %s2099_s28, %s2419_s1 }
   0x7   :  { %p2105_p2 = pnand %p2103_p1, %p2100_p0 }
   0x9   :  { %2108 = shalt.err (!%p2105_p2)
}
   0xa   :  { %s2109_s10 = scalar_lea.vmem %s32_s25, 2048  ;;  %p2114_p4 = scmp.lt.s32.totalorder %s32_s25, %s32_s25 }
   0xb   :  { %p2110_p3 = scmp.ne.s32.totalorder %s32_s25, %s2109_s10  ;;  %p2115_p5 = scmp.lt.s32.totalorder %s2109_s10, %s2109_s10 }
   0xd   :  { %p2116_p6 = por %p2115_p5, %p2114_p4 }
   0xf   :  { %p2117_p7 = pnand %p2116_p6, %p2110_p3 }
  0x11   :  { %2120 = shalt.err (!%p2117_p7)
}
  0x12   :  { %s2240_s11 = smov 512   ;;  %s2241_s12 = smov 32  }
  0x13   :  { %37 = dma.hbm_to_vmem [thread:$0]  %s2419_s1, 2048, %s32_s25, [#allocation6], %s2240_s11, %s2240_s11, %s2241_s12  }
  0x14   :  { %s2242_s15 = smov [#allocation8]   ;;  %s2121_s19 = scalar_lea.hbm %s2421_s3, 16384 }
  0x15   :  { %s53_s16 = sshll.u32 %s2242_s15, 4  ;;  %p2122_p8 = scmp.ne.s32.totalorder %s2421_s3, %s2121_s19  ;;  %s54_s16 = int_to_ptr.vmem [resolvable:$true] %s53_s16 }
  0x16   :  { %p2125_p9 = scmp.lt.u32.totalorder %s2121_s19, %s2421_s3 }
  0x18   :  { %p2127_p10 = pnand %p2125_p9, %p2122_p8 }
  0x1a   :  { %2130 = shalt.err (!%p2127_p10)
}
  0x1b   :  { %s2131_s24 = scalar_lea.vmem %s54_s16, 16384  ;;  %p2136_p12 = scmp.lt.s32.totalorder %s54_s16, %s54_s16 }
  0x1c   :  { %p2132_p11 = scmp.ne.s32.totalorder %s54_s16, %s2131_s24  ;;  %p2137_p13 = scmp.lt.s32.totalorder %s2131_s24, %s2131_s24 }
  0x1e   :  { %p2138_p0 = por %p2137_p13, %p2136_p12 }
  0x20   :  { %p2139_p1 = pnand %p2138_p0, %p2132_p11 }
  0x22   :  { %2142 = shalt.err (!%p2139_p1)
}
  0x23   :  { %s2243_s1 = smov 128   ;;  %s2244_s25 = smov 8  }
  0x24   :  { %59 = dma.hbm_to_vmem [thread:$0]  %s2421_s3, 16384, %s54_s16, [#allocation9], %s2243_s1, %s2243_s1, %s2244_s25  }
  0x25   :  { %s2245_s28 = smov [#allocation2]   ;;  %s2246_s30 = smov [#allocation7]  }
  0x26   :  { %s22_s29 = sshll.u32 %s2245_s28, 4  ;;  %s44_s8 = sshll.u32 %s2246_s30, 4  ;;  %s23_s29 = int_to_ptr.vmem [resolvable:$true] %s22_s29  ;;  %s45_s8 = int_to_ptr.vmem [resolvable:$true] %s44_s8 }
  0x27   :  { %s2143_s11 = scalar_lea.hbm %s2418_s0, 64 }
  0x28   :  { %p2144_p2 = scmp.ne.s32.totalorder %s2418_s0, %s2143_s11  ;;  %p2147_p3 = scmp.lt.u32.totalorder %s2143_s11, %s2418_s0 }
  0x2a   :  { %p2149_p4 = pnand %p2147_p3, %p2144_p2 }
  0x2c   :  { %2152 = shalt.err (!%p2149_p4)
}
  0x2d   :  { %s2153_s3 = scalar_lea.vmem %s23_s29, 64  ;;  %p2158_p6 = scmp.lt.s32.totalorder %s23_s29, %s23_s29 }
  0x2e   :  { %p2154_p5 = scmp.ne.s32.totalorder %s23_s29, %s2153_s3  ;;  %p2159_p7 = scmp.lt.s32.totalorder %s2153_s3, %s2153_s3 }
  0x30   :  { %p2160_p8 = por %p2159_p7, %p2158_p6 }
  0x32   :  { %p2161_p9 = pnand %p2160_p8, %p2154_p5 }
  0x34   :  { %2164 = shalt.err (!%p2161_p9)
}
  0x35   :  { %25 = dma.hbm_to_vmem [thread:$0]  %s2418_s0, 64, %s23_s29, [#allocation3]  }
  0x36   :  { %s2165_s20 = scalar_lea.hbm %s2420_s2, 128 }
  0x37   :  { %p2166_p10 = scmp.ne.s32.totalorder %s2420_s2, %s2165_s20  ;;  %p2169_p11 = scmp.lt.u32.totalorder %s2165_s20, %s2420_s2 }
  0x39   :  { %p2171_p12 = pnand %p2169_p11, %p2166_p10 }
  0x3b   :  { %2174 = shalt.err (!%p2171_p12)
}
  0x3c   :  { %s2175_s1 = scalar_lea.vmem %s45_s8, 128  ;;  %p2180_p0 = scmp.lt.s32.totalorder %s45_s8, %s45_s8 }
  0x3d   :  { %p2176_p13 = scmp.ne.s32.totalorder %s45_s8, %s2175_s1  ;;  %p2181_p1 = scmp.lt.s32.totalorder %s2175_s1, %s2175_s1 }
  0x3f   :  { %p2182_p2 = por %p2181_p1, %p2180_p0 }
  0x41   :  { %p2183_p3 = pnand %p2182_p2, %p2176_p13 }
  0x43   :  { %2186 = shalt.err (!%p2183_p3)
}
  0x44   :  { %47 = dma.hbm_to_vmem [thread:$0]  %s2420_s2, 128, %s45_s8, [#allocation6]  }
  0x45   :  { %s2247_s26 = smov [#allocation10]   ;;  %s2187_s30 = scalar_lea.hbm %s2423_s5, 2048 }
  0x46   :  { %s67_s27 = sshll.u32 %s2247_s26, 4  ;;  %p2188_p4 = scmp.ne.s32.totalorder %s2423_s5, %s2187_s30  ;;  %s68_s27 = int_to_ptr.vmem [resolvable:$true] %s67_s27 }
  0x47   :  { %p2191_p5 = scmp.lt.u32.totalorder %s2187_s30, %s2423_s5 }
  0x49   :  { %p2193_p6 = pnand %p2191_p5, %p2188_p4 }
  0x4b   :  { %2196 = shalt.err (!%p2193_p6)
}
  0x4c   :  { %s2197_s13 = scalar_lea.vmem %s68_s27, 2048  ;;  %p2202_p8 = scmp.lt.s32.totalorder %s68_s27, %s68_s27 }
  0x4d   :  { %p2198_p7 = scmp.ne.s32.totalorder %s68_s27, %s2197_s13  ;;  %p2203_p9 = scmp.lt.s32.totalorder %s2197_s13, %s2197_s13 }
  0x4f   :  { %p2204_p10 = por %p2203_p9, %p2202_p8 }
  0x51   :  { %p2205_p11 = pnand %p2204_p10, %p2198_p7 }
  0x53   :  { %2208 = shalt.err (!%p2205_p11)
}
  0x54   :  { %s2248_s2 = smov 64   ;;  %s2249_s8 = smov 4  }
  0x55   :  { %73 = dma.hbm_to_vmem [thread:$0]  %s2423_s5, 2048, %s68_s27, [#allocation9], %s2248_s2, %s2248_s2, %s2249_s8  }
  0x56   :  { %2231 = dma.done.wait [#allocation3], 64  }
  0x57   :  { %2232 = vsyncadd [#allocation3], 4294967232 }
  0x58   :  { %2233 = dma.done.wait [#allocation6], 2176  }
  0x59   :  { %2234 = vsyncadd [#allocation6], 4294965120 }
  0x5a   :  { %2235 = dma.done.wait [#allocation9], 18432  }
  0x5b   :  { %2236 = vsyncadd [#allocation9], 4294948864  ;;  %v2250_v0 = vmov 0   ;;  %v93_v1 = vld [vmem:[#allocation5] sm:$0xff]  ;;  %v94_v8 = vld [vmem:[#allocation5 + $0x8] sm:$0xff]  ;;  %vm231_vm0 = vcmask 261120  }
  0x5c   :  { %267 = vmatprep.mubr.bf16.mxu0 %v2250_v0  ;;  %v97_v2 = vld [vmem:[#allocation5 + $0x20] sm:$0xff]  ;;  %v98_v9 = vld [vmem:[#allocation5 + $0x28] sm:$0xff]  ;;  %v2353_v17 = vld [vmem:[#allocation2] sm:$0xf]  ;;  %s2251_s17 = smov [#allocation11]  }
  0x5d   :  { %v101_v3 = vld [vmem:[#allocation5 + $0x40] sm:$0xff]  ;;  %v1636_v4 = vcombine.high %v93_v1, %v97_v2  ;;  %v1635_v5 = vcombine.low %v93_v1, %v97_v2  ;;  %v1638_v11 = vcombine.high %v94_v8, %v98_v9  ;;  %v102_v12 = vld [vmem:[#allocation5 + $0x48] sm:$0xff]  ;;  %v1637_v18 = vcombine.low %v94_v8, %v98_v9  ;;  %v95_v20 = vld [vmem:[#allocation5 + $0x10] sm:$0xff]  ;;  %s1624_s18 = sshll.u32 %s2251_s17, 4  ;;  %s1625_s18 = int_to_ptr.vmem [resolvable:$true] %s1624_s18 }
  0x5e   :  { %v105_v6 = vld [vmem:[#allocation5 + $0x60] sm:$0xff]  ;;  %v106_v13 = vld [vmem:[#allocation5 + $0x68] sm:$0xff]  ;;  %v99_v22 = vld [vmem:[#allocation5 + $0x30] sm:$0xff]  ;;  %p2214_p13 = scmp.lt.s32.totalorder %s1625_s18, %s1625_s18 }
  0x5f   :  { %v1644_v7 = vcombine.high %v101_v3, %v105_v6  ;;  %235 = vmatprep.subr.bf16.mxu0 %v1636_v4  ;;  %v1643_v10 = vcombine.low %v101_v3, %v105_v6  ;;  %v1847_v14 = vld [vmem:[#allocation8 + $0x4] ss:$8 sps:$4 sm:$0xff]   ;;  %v1849_v15 = vld [vmem:[#allocation8] ss:$8 sps:$4 sm:$0xff]   ;;  %v1850_v16 = vld [vmem:[#allocation8 + $0x14] ss:$8 sps:$4 sm:$0xff]   ;;  %v1646_v19 = vcombine.high %v102_v12, %v106_v13  ;;  %v1645_v24 = vcombine.low %v102_v12, %v106_v13 }
  0x60   :  { %236 = vmatpush1.bf16.msra.mxu0 %v1635_v5  ;;  %1251 = vmatprep.subr.bf16.mxu1 %v1847_v14  ;;  %v1852_v21 = vld [vmem:[#allocation8 + $0x10] ss:$8 sps:$4 sm:$0xff]   ;;  %v1853_v23 = vld [vmem:[#allocation8 + $0x24] ss:$8 sps:$4 sm:$0xff]   ;;  %v1640_v26 = vcombine.high %v95_v20, %v99_v22  ;;  %v1855_v28 = vld [vmem:[#allocation8 + $0x20] ss:$8 sps:$4 sm:$0xff]   ;;  %v1639_v30 = vcombine.low %v95_v20, %v99_v22 }
  0x61   :  { %237 = vmatprep.subr.bf16.mxu0 %v1644_v7  ;;  %1252 = vmatpush1.bf16.msra.mxu1 %v1849_v15  ;;  %v103_v25 = vld [vmem:[#allocation5 + $0x50] sm:$0xff]  ;;  %v1856_v29 = vld [vmem:[#allocation8 + $0x34] ss:$8 sps:$4 sm:$0xff]   ;;  %v1858_v32 = vld [vmem:[#allocation8 + $0x30] ss:$8 sps:$4 sm:$0xff]  }
  0x62   :  { %1253 = vmatprep.subr.bf16.mxu1 %v1850_v16  ;;  %v107_v27 = vld [vmem:[#allocation5 + $0x70] sm:$0xff]  ;;  %v96_v33 = vld [vmem:[#allocation5 + $0x18] sm:$0xff] }
  0x63   :  { %v1648_v31 = vcombine.high %v103_v25, %v107_v27  ;;  %v100_v34 = vld [vmem:[#allocation5 + $0x38] sm:$0xff]  ;;  %v1859_v35 = vld [vmem:[#allocation8 + $0x44] ss:$8 sps:$4 sm:$0xff]   ;;  %v1864_v36 = vld [vmem:[#allocation8 + $0x40] ss:$8 sps:$4 sm:$0xff]   ;;  %v1647_v37 = vcombine.low %v103_v25, %v107_v27 }
  0x64   :  { %238 = vmatpush1.bf16.msra.mxu0 %v1643_v10  ;;  %v104_v38 = vld [vmem:[#allocation5 + $0x58] sm:$0xff]  ;;  %v1642_v41 = vcombine.high %v96_v33, %v100_v34  ;;  %v1641_v43 = vcombine.low %v96_v33, %v100_v34  ;;  %v1871_v44 = vld [vmem:[#allocation8 + $0x64] ss:$8 sps:$4 sm:$0xff]   ;;  %v1861_v48 = vld [vmem:[#allocation8 + $0x200] ss:$8 sps:$4 sm:$0xff]  }
  0x65   :  { %276 = vmatprep.subr.bf16.mxu0 %v1638_v11  ;;  %1254 = vmatpush1.bf16.msra.mxu1 %v1852_v21  ;;  %v108_v39 = vld [vmem:[#allocation5 + $0x78] sm:$0xff]  ;;  %v1863_v46 = vld [vmem:[#allocation8 + $0x204] ss:$8 sps:$4 sm:$0xff]   ;;  %v1873_v52 = vld [vmem:[#allocation8 + $0x220] ss:$8 sps:$4 sm:$0xff]  }
  0x66   :  { %1255 = vmatprep.subr.bf16.mxu1 %v1853_v23  ;;  %v1865_v40 = vld [vmem:[#allocation8 + $0x54] ss:$8 sps:$4 sm:$0xff]   ;;  %v1870_v42 = vld [vmem:[#allocation8 + $0x50] ss:$8 sps:$4 sm:$0xff]   ;;  %v1650_v45 = vcombine.high %v104_v38, %v108_v39  ;;  %v1649_v47 = vcombine.low %v104_v38, %v108_v39  ;;  %v1875_v51 = vld [vmem:[#allocation8 + $0x224] ss:$8 sps:$4 sm:$0xff]  }
  0x67   :  { %1651 = vmatmul.mubr.msk.bf16.vlgmr.msra.gmra.mrb[0].mxu0 %vm231_vm0, %v2353_v17  ;;  %v1869_v49 = vld [vmem:[#allocation8 + $0x214] ss:$8 sps:$4 sm:$0xff]   ;;  %v1867_v50 = vld [vmem:[#allocation8 + $0x210] ss:$8 sps:$4 sm:$0xff]   ;;  %v1876_v53 = vld [vmem:[#allocation8 + $0x60] ss:$8 sps:$4 sm:$0xff]  }
  0x68   :  { %277 = vmatpush1.bf16.msra.mxu0 %v1637_v18  ;;  %308 = vmatprep.mubr.bf16.mxu0 %v2250_v0  ;;  %v1877_v54 = vld [vmem:[#allocation8 + $0x74] ss:$8 sps:$4 sm:$0xff]   ;;  %v1879_v56 = vld [vmem:[#allocation8 + $0x230] ss:$8 sps:$4 sm:$0xff]   ;;  %v1883_v58 = vld [vmem:[#allocation8 + $0x84] ss:$8 sps:$4 sm:$0xff]  }
  0x69   :  { %278 = vmatprep.subr.bf16.mxu0 %v1646_v19  ;;  %1256 = vmatpush1.bf16.msra.mxu1 %v1855_v28  ;;  %v1881_v55 = vld [vmem:[#allocation8 + $0x234] ss:$8 sps:$4 sm:$0xff]   ;;  %v1882_v57 = vld [vmem:[#allocation8 + $0x70] ss:$8 sps:$4 sm:$0xff]   ;;  %v1887_v59 = vld [vmem:[#allocation8 + $0x244] ss:$8 sps:$4 sm:$0xff]  }
  0x6a   :  { %1257 = vmatprep.subr.bf16.mxu1 %v1856_v29  ;;  %v1885_v60 = vld [vmem:[#allocation8 + $0x240] ss:$8 sps:$4 sm:$0xff]   ;;  %v1889_v62 = vld [vmem:[#allocation8 + $0x94] ss:$8 sps:$4 sm:$0xff]   ;;  %v1894_v1 = vld [vmem:[#allocation8 + $0x90] ss:$8 sps:$4 sm:$0xff]  }
  0x6b   :  { %v1888_v61 = vld [vmem:[#allocation8 + $0x80] ss:$8 sps:$4 sm:$0xff]   ;;  %v1893_v63 = vld [vmem:[#allocation8 + $0x254] ss:$8 sps:$4 sm:$0xff]   ;;  %v1895_v2 = vld [vmem:[#allocation8 + $0xa4] ss:$8 sps:$4 sm:$0xff]  }
  0x6c   :  { %279 = vmatpush1.bf16.msra.mxu0 %v1645_v24  ;;  %v1899_v3 = vld [vmem:[#allocation8 + $0x264] ss:$8 sps:$4 sm:$0xff]   ;;  %v1897_v4 = vld [vmem:[#allocation8 + $0x260] ss:$8 sps:$4 sm:$0xff]   ;;  %v1901_v6 = vld [vmem:[#allocation8 + $0xb4] ss:$8 sps:$4 sm:$0xff]  }
  0x6d   :  { %317 = vmatprep.subr.bf16.mxu0 %v1640_v26  ;;  %1258 = vmatpush1.bf16.msra.mxu1 %v1858_v32  ;;  %v1900_v5 = vld [vmem:[#allocation8 + $0xa0] ss:$8 sps:$4 sm:$0xff]   ;;  %v1905_v7 = vld [vmem:[#allocation8 + $0x274] ss:$8 sps:$4 sm:$0xff]   ;;  %v1903_v8 = vld [vmem:[#allocation8 + $0x270] ss:$8 sps:$4 sm:$0xff]  }
  0x6e   :  { %1259 = vmatprep.subr.bf16.mxu1 %v1859_v35  ;;  %v1906_v9 = vld [vmem:[#allocation8 + $0xb0] ss:$8 sps:$4 sm:$0xff]   ;;  %v1907_v10 = vld [vmem:[#allocation8 + $0xc4] ss:$8 sps:$4 sm:$0xff]   ;;  %v1909_v12 = vld [vmem:[#allocation8 + $0x280] ss:$8 sps:$4 sm:$0xff]  }
  0x6f   :  { %1652 = vmatmul.mubr.msk.bf16.vlgmr.msra.gmra.mrb[4].mxu0 %vm231_vm0, %v2353_v17  ;;  %v1911_v11 = vld [vmem:[#allocation8 + $0x284] ss:$8 sps:$4 sm:$0xff]   ;;  %v1912_v13 = vld [vmem:[#allocation8 + $0xc0] ss:$8 sps:$4 sm:$0xff]   ;;  %v1913_v14 = vld [vmem:[#allocation8 + $0xd4] ss:$8 sps:$4 sm:$0xff]  }
  0x70   :  { %318 = vmatpush1.bf16.msra.mxu0 %v1639_v30  ;;  %349 = vmatprep.mubr.bf16.mxu0 %v2250_v0  ;;  %v1917_v15 = vld [vmem:[#allocation8 + $0x294] ss:$8 sps:$4 sm:$0xff]   ;;  %v1915_v16 = vld [vmem:[#allocation8 + $0x290] ss:$8 sps:$4 sm:$0xff]   ;;  %v1919_v18 = vld [vmem:[#allocation8 + $0xe4] ss:$8 sps:$4 sm:$0xff]  }
  0x71   :  { %319 = vmatprep.subr.bf16.mxu0 %v1648_v31  ;;  %1260 = vmatpush1.bf16.msra.mxu1 %v1864_v36  ;;  %v1923_v19 = vld [vmem:[#allocation8 + $0x2a4] ss:$8 sps:$4 sm:$0xff]   ;;  %v1921_v20 = vld [vmem:[#allocation8 + $0x2a0] ss:$8 sps:$4 sm:$0xff]   ;;  %v1925_v22 = vld [vmem:[#allocation8 + $0xf4] ss:$8 sps:$4 sm:$0xff]   ;;  %v111_v36 = vlaneseq }
  0x72   :  { %1261 = vmatprep.subr.bf16.mxu1 %v1865_v40  ;;  %v1924_v21 = vld [vmem:[#allocation8 + $0xe0] ss:$8 sps:$4 sm:$0xff]   ;;  %v1929_v23 = vld [vmem:[#allocation8 + $0x2b4] ss:$8 sps:$4 sm:$0xff]   ;;  %v1927_v24 = vld [vmem:[#allocation8 + $0x2b0] ss:$8 sps:$4 sm:$0xff]  }
  0x73   :  { %v1930_v25 = vld [vmem:[#allocation8 + $0xf0] ss:$8 sps:$4 sm:$0xff]   ;;  %v1933_v26 = vld [vmem:[#allocation8 + $0x104] ss:$8 sps:$4 sm:$0xff]   ;;  %v1934_v28 = vld [vmem:[#allocation8 + $0x2c0] ss:$8 sps:$4 sm:$0xff]  }
  0x74   :  { %320 = vmatpush1.bf16.msra.mxu0 %v1647_v37  ;;  %v1936_v27 = vld [vmem:[#allocation8 + $0x2c4] ss:$8 sps:$4 sm:$0xff]   ;;  %v1940_v29 = vld [vmem:[#allocation8 + $0x2d0] ss:$8 sps:$4 sm:$0xff]   ;;  %v1942_v30 = vld [vmem:[#allocation8 + $0x2d4] ss:$8 sps:$4 sm:$0xff]  }
  0x75   :  { %358 = vmatprep.subr.bf16.mxu0 %v1642_v41  ;;  %1262 = vmatpush1.bf16.msra.mxu1 %v1870_v42  ;;  %v1946_v31 = vld [vmem:[#allocation8 + $0x2e0] ss:$8 sps:$4 sm:$0xff]   ;;  %v1948_v32 = vld [vmem:[#allocation8 + $0x2e4] ss:$8 sps:$4 sm:$0xff]   ;;  %v1952_v33 = vld [vmem:[#allocation8 + $0x2f0] ss:$8 sps:$4 sm:$0xff]  }
  0x76   :  { %1263 = vmatprep.subr.bf16.mxu1 %v1871_v44  ;;  %v1954_v34 = vld [vmem:[#allocation8 + $0x2f4] ss:$8 sps:$4 sm:$0xff]   ;;  %v1960_v35 = vld [vmem:[#allocation8 + $0x304] ss:$8 sps:$4 sm:$0xff]   ;;  %v2366_v37 = vshrl.u32 %v111_v36, 7 }
  0x77   :  { %1653 = vmatmul.mubr.msk.bf16.vlgmr.msra.gmra.mrb[8].mxu0 %vm231_vm0, %v2353_v17  ;;  %v2369_v39 = vld [vmem:[#allocation7] sm:$0xff] }
  0x78   :  { %359 = vmatpush1.bf16.msra.mxu0 %v1641_v43  ;;  %390 = vmatprep.mubr.bf16.mxu0 %v2250_v0  ;;  %v1891_v0 = vld [vmem:[#allocation8 + $0x250] ss:$8 sps:$4 sm:$0xff]   ;;  %v113_v38 = vsub.s32 0, %v2366_v37  ;;  %v117_v40 = vsub.s32 1, %v2366_v37 }
  0x79   :  { %360 = vmatprep.subr.bf16.mxu0 %v1650_v45  ;;  %1264 = vmatpush1.bf16.msra.mxu1 %v1876_v53 }
  0x7a   :  { %1265 = vmatprep.subr.bf16.mxu1 %v1877_v54  ;;  %v114_v41 = vrot.slane %v2369_v39, %v113_v38  ;;  %v118_v42 = vrot.slane %v2369_v39, %v117_v40 }
  0x7c   :  { %361 = vmatpush1.bf16.msra.mxu0 %v1649_v47 }
  0x7d   :  { %1333 = vmatprep.subr.bf16.mxu0 %v1863_v46  ;;  %1266 = vmatpush1.bf16.msra.mxu1 %v1882_v57 }
  0x7e   :  { %1267 = vmatprep.subr.bf16.mxu1 %v1883_v58 }
  0x7f   :  { %1654 = vmatmul.mubr.msk.bf16.vlgmr.msra.gmra.mrb[12].mxu0 %vm231_vm0, %v2353_v17  ;;  %v1918_v17 = vld [vmem:[#allocation8 + $0xd0] ss:$8 sps:$4 sm:$0xff]  }
  0x80   :  { %1334 = vmatpush1.bf16.msra.mxu0 %v1861_v48  ;;  %v125_v48 = vsub.s32 3, %v2366_v37 }
  0x81   :  { %1335 = vmatprep.subr.bf16.mxu0 %v1869_v49  ;;  %1268 = vmatpush1.bf16.msra.mxu1 %v1888_v61 }
  0x82   :  { %1269 = vmatprep.subr.bf16.mxu1 %v1889_v62  ;;  %v126_v54 = vrot.slane %v2369_v39, %v125_v48  ;;  %v133_v62 = vsub.s32 5, %v2366_v37 }
  0x84   :  { %1336 = vmatpush1.bf16.msra.mxu0 %v1867_v50 }
  0x85   :  { %1337 = vmatprep.subr.bf16.mxu0 %v1875_v51  ;;  %1270 = vmatpush1.bf16.msra.mxu1 %v1894_v1 }
  0x86   :  { %1271 = vmatprep.subr.bf16.mxu1 %v1895_v2 }
  0x88   :  { %1338 = vmatpush1.bf16.msra.mxu0 %v1873_v52 }
  0x89   :  { %1339 = vmatprep.subr.bf16.mxu0 %v1881_v55  ;;  %1272 = vmatpush1.bf16.msra.mxu1 %v1900_v5 }
  0x8a   :  { %1273 = vmatprep.subr.bf16.mxu1 %v1901_v6 }
  0x8c   :  { %1340 = vmatpush1.bf16.msra.mxu0 %v1879_v56 }
  0x8d   :  { %1341 = vmatprep.subr.bf16.mxu0 %v1887_v59  ;;  %1274 = vmatpush1.bf16.msra.mxu1 %v1906_v9  ;;  %v129_v59 = vsub.s32 4, %v2366_v37 }
  0x8e   :  { %1275 = vmatprep.subr.bf16.mxu1 %v1907_v10  ;;  %v141_v10 = vsub.s32 7, %v2366_v37 }
  0x8f   :  { %v130_v1 = vrot.slane %v2369_v39, %v129_v59  ;;  %v1943_v59 = vld [vmem:[#allocation8 + $0x120] ss:$8 sps:$4 sm:$0xff]  }
  0x90   :  { %1342 = vmatpush1.bf16.msra.mxu0 %v1885_v60 }
  0x91   :  { %1343 = vmatprep.subr.bf16.mxu0 %v1893_v63  ;;  %1276 = vmatpush1.bf16.msra.mxu1 %v1912_v13 }
  0x92   :  { %1277 = vmatprep.subr.bf16.mxu1 %v1913_v14 }
  0x94   :  { %1344 = vmatpush1.bf16.msra.mxu0 %v1891_v0 }
  0x95   :  { %1345 = vmatprep.subr.bf16.mxu0 %v1899_v3  ;;  %1278 = vmatpush1.bf16.msra.mxu1 %v1918_v17  ;;  %v134_v3 = vrot.slane %v2369_v39, %v133_v62 }
  0x96   :  { %1279 = vmatprep.subr.bf16.mxu1 %v1919_v18 }
  0x98   :  { %1346 = vmatpush1.bf16.msra.mxu0 %v1897_v4 }
  0x99   :  { %1347 = vmatprep.subr.bf16.mxu0 %v1905_v7  ;;  %1280 = vmatpush1.bf16.msra.mxu1 %v1924_v21 }
  0x9a   :  { %1281 = vmatprep.subr.bf16.mxu1 %v1925_v22 }
  0x9c   :  { %1348 = vmatpush1.bf16.msra.mxu0 %v1903_v8 }
  0x9d   :  { %1349 = vmatprep.subr.bf16.mxu0 %v1911_v11  ;;  %1282 = vmatpush1.bf16.msra.mxu1 %v1930_v25 }
  0x9e   :  { %1292 = vmatprep.subr.bf16.mxu1 %v1933_v26 }
  0xa0   :  { %1350 = vmatpush1.bf16.msra.mxu0 %v1909_v12 }
  0xa1   :  { %1351 = vmatprep.subr.bf16.mxu0 %v1917_v15 }
  0xa4   :  { %1352 = vmatpush1.bf16.msra.mxu0 %v1915_v16 }
  0xa5   :  { %1353 = vmatprep.subr.bf16.mxu0 %v1923_v19 }
  0xa8   :  { %1354 = vmatpush1.bf16.msra.mxu0 %v1921_v20  ;;  %v142_v20 = vrot.slane %v2369_v39, %v141_v10  ;;  %v1963_v10 = vld [vmem:[#allocation8 + $0x154] ss:$8 sps:$4 sm:$0xff]  }
  0xa9   :  { %1355 = vmatprep.subr.bf16.mxu0 %v1929_v23 }
  0xac   :  { %1356 = vmatpush1.bf16.msra.mxu0 %v1927_v24 }
  0xad   :  { %1357 = vmatprep.subr.bf16.mxu0 %v1936_v27 }
  0xb0   :  { %1358 = vmatpush1.bf16.msra.mxu0 %v1934_v28 }
  0xb1   :  { %1359 = vmatprep.subr.bf16.mxu0 %v1942_v30 }
  0xb4   :  { %1360 = vmatpush1.bf16.msra.mxu0 %v1940_v29 }
  0xb5   :  { %1361 = vmatprep.subr.bf16.mxu0 %v1948_v32 }
  0xb8   :  { %1362 = vmatpush1.bf16.msra.mxu0 %v1946_v31 }
  0xb9   :  { %1363 = vmatprep.subr.bf16.mxu0 %v1954_v34 }
  0xbc   :  { %1364 = vmatpush1.bf16.msra.mxu0 %v1952_v33 }
  0xbd   :  { %1374 = vmatprep.subr.bf16.mxu0 %v1960_v35 }
 0x13a   :  { %v269_v43 = vpop.f32.mrb[0].mxu0 }
 0x13b   :  { %v270_v44 = vadd.f32 %v269_v43, %v114_v41  ;;  %v271_v45 = vpop.f32.mrb[1].mxu0 }
 0x13c   :  { %v272_v46 = vadd.f32 %v271_v45, %v118_v42  ;;  %v273_v47 = vpop.f32.mrb[2].mxu0 }
 0x13d   :  { %v399_v49 = vpack.c.bf16 %v270_v44, %v270_v44  ;;  %v274_v50 = vpop.f32.mrb[3].mxu0  ;;  %v1931_v47 = vld [vmem:[#allocation8 + $0x100] ss:$8 sps:$4 sm:$0xff]  }
 0x13e   :  { %v400_v51 = vpack.c.bf16 %v272_v46, %v272_v46  ;;  %v1939_v50 = vld [vmem:[#allocation8 + $0x114] ss:$8 sps:$4 sm:$0xff]  }
 0x13f   :  { %v407_v52 = vsub.bf16 0, %v399_v49 }
 0x140   :  { %v408_v53 = vsub.bf16 0, %v400_v51 }
 0x141   :  { %v416_v55 = vmul.bf16 1069105081, %v407_v52  ;;  %v1937_v52 = vld [vmem:[#allocation8 + $0x110] ss:$8 sps:$4 sm:$0xff]  }
 0x142   :  { %v419_v56 = vmul.bf16 1069105081, %v408_v53  ;;  %v2380_v57 = vpop.f32.mrb[4].mxu0 }
 0x143   :  { %2055 = vpow.bf16 %v416_v55  ;;  %v312_v58 = vpop.f32.mrb[5].mxu0  ;;  %v121_v55 = vsub.s32 2, %v2366_v37 }
 0x144   :  { %2057 = vpow.bf16 %v419_v56  ;;  %v313_v60 = vadd.f32 %v312_v58, %v126_v54  ;;  %v314_v61 = vpop.f32.mrb[6].mxu0  ;;  %v1945_v54 = vld [vmem:[#allocation8 + $0x124] ss:$8 sps:$4 sm:$0xff]  }
 0x145   :  { %v315_v63 = vpop.f32.mrb[7].mxu0  ;;  %v122_v62 = vrot.slane %v2369_v39, %v121_v55 }
 0x146   :  { %v402_v0 = vpack.c.bf16 %v313_v60, %v313_v60  ;;  %v1951_v60 = vld [vmem:[#allocation8 + $0x134] ss:$8 sps:$4 sm:$0xff]  }
 0x148   :  { %v410_v2 = vsub.bf16 0, %v402_v0  ;;  %v1949_v0 = vld [vmem:[#allocation8 + $0x130] ss:$8 sps:$4 sm:$0xff]  }
 0x14a   :  { %v425_v4 = vmul.bf16 1069105081, %v410_v2  ;;  %v351_v5 = vpop.f32.mrb[8].mxu0  ;;  %v1957_v2 = vld [vmem:[#allocation8 + $0x144] ss:$8 sps:$4 sm:$0xff]  }
 0x14b   :  { %v352_v6 = vadd.f32 %v351_v5, %v130_v1  ;;  %v353_v7 = vpop.f32.mrb[9].mxu0 }
 0x14c   :  { %2059 = vpow.bf16 %v425_v4  ;;  %v354_v8 = vadd.f32 %v353_v7, %v134_v3  ;;  %v355_v9 = vpop.f32.mrb[10].mxu0  ;;  %v311_v4 = vadd.f32 %v2380_v57, %v122_v62  ;;  %v1955_v7 = vld [vmem:[#allocation8 + $0x140] ss:$8 sps:$4 sm:$0xff]   ;;  %v137_v57 = vsub.s32 6, %v2366_v37  ;;  %v2020_v62 = vld [vmem:[#allocation8 + $0x3a4] ss:$8 sps:$4 sm:$0xff]  }
 0x14d   :  { %v403_v11 = vpack.c.bf16 %v352_v6, %v352_v6  ;;  %v356_v12 = vpop.f32.mrb[11].mxu0  ;;  %v1958_v6 = vld [vmem:[#allocation8 + $0x300] ss:$8 sps:$4 sm:$0xff]   ;;  %v1966_v9 = vld [vmem:[#allocation8 + $0x314] ss:$8 sps:$4 sm:$0xff]  }
 0x14e   :  { %v2056_v13 = vpop.eup %2055  ;;  %v404_v14 = vpack.c.bf16 %v354_v8, %v354_v8  ;;  %v1964_v12 = vld [vmem:[#allocation8 + $0x310] ss:$8 sps:$4 sm:$0xff]  }
 0x14f   :  { %v2058_v15 = vpop.eup %2057  ;;  %v439_v16 = vunpack.c.l.bf16 %v2056_v13  ;;  %v411_v17 = vsub.bf16 0, %v403_v11  ;;  %v401_v11 = vpack.c.bf16 %v311_v4, %v311_v4  ;;  %v1961_v13 = vld [vmem:[#allocation8 + $0x150] ss:$8 sps:$4 sm:$0xff]   ;;  %v2023_v4 = vld [vmem:[#allocation8 + $0x1f4] ss:$8 sps:$4 sm:$0xff]  }
 0x150   :  { %v412_v18 = vsub.bf16 0, %v404_v14  ;;  %v440_v19 = vunpack.c.l.bf16 %v2058_v15  ;;  %v1972_v14 = vld [vmem:[#allocation8 + $0x324] ss:$8 sps:$4 sm:$0xff]  }
 0x151   :  { %v447_v21 = vadd.f32 1.0, %v439_v16  ;;  %v428_v22 = vmul.bf16 1069105081, %v411_v17  ;;  %v1969_v15 = vld [vmem:[#allocation8 + $0x164] ss:$8 sps:$4 sm:$0xff]   ;;  %v409_v16 = vsub.bf16 0, %v401_v11 }
 0x152   :  { %v431_v23 = vmul.bf16 1069105081, %v412_v18  ;;  %v448_v24 = vadd.f32 1.0, %v440_v19  ;;  %v2388_v25 = vpop.f32.mrb[12].mxu0  ;;  %v1970_v18 = vld [vmem:[#allocation8 + $0x320] ss:$8 sps:$4 sm:$0xff]  }
 0x153   :  { %2061 = vrcp.f32 %v447_v21  ;;  %v394_v26 = vpop.f32.mrb[13].mxu0  ;;  %v1967_v19 = vld [vmem:[#allocation8 + $0x160] ss:$8 sps:$4 sm:$0xff]  }
 0x154   :  { %2063 = vpow.bf16 %v428_v22  ;;  %v395_v27 = vadd.f32 %v394_v26, %v142_v20  ;;  %v396_v28 = vpop.f32.mrb[14].mxu0  ;;  %v1978_v20 = vld [vmem:[#allocation8 + $0x334] ss:$8 sps:$4 sm:$0xff]   ;;  %v1976_v26 = vld [vmem:[#allocation8 + $0x330] ss:$8 sps:$4 sm:$0xff]  }
 0x155   :  { %2065 = vpow.bf16 %v431_v23  ;;  %v397_v29 = vpop.f32.mrb[15].mxu0  ;;  %v1975_v22 = vld [vmem:[#allocation8 + $0x174] ss:$8 sps:$4 sm:$0xff]   ;;  %v138_v23 = vrot.slane %v2369_v39, %v137_v57  ;;  %v1984_v28 = vld [vmem:[#allocation8 + $0x344] ss:$8 sps:$4 sm:$0xff]  }
 0x156   :  { %2067 = vrcp.f32 %v448_v24  ;;  %v406_v30 = vpack.c.bf16 %v395_v27, %v395_v27  ;;  %v422_v24 = vmul.bf16 1069105081, %v409_v16  ;;  %v1973_v27 = vld [vmem:[#allocation8 + $0x170] ss:$8 sps:$4 sm:$0xff]   ;;  %v1981_v29 = vld [vmem:[#allocation8 + $0x184] ss:$8 sps:$4 sm:$0xff]  }
 0x157   :  { %v2060_v31 = vpop.eup %2059  ;;  %v1987_v39 = vld [vmem:[#allocation8 + $0x194] ss:$8 sps:$4 sm:$0xff]   ;;  %v2027_v11 = vld [vmem:[#allocation8 + $0x3c0] ss:$8 sps:$4 sm:$0xff]  }
 0x158   :  { %v442_v32 = vunpack.c.l.bf16 %v2060_v31  ;;  %v414_v33 = vsub.bf16 0, %v406_v30  ;;  %v393_v30 = vadd.f32 %v2388_v25, %v138_v23  ;;  %v1982_v31 = vld [vmem:[#allocation8 + $0x340] ss:$8 sps:$4 sm:$0xff]   ;;  %v2038_v16 = vld [vmem:[#allocation8 + $0x3f4] ss:$8 sps:$4 sm:$0xff]  }
 0x159   :  { %v1994_v25 = vld [vmem:[#allocation8 + $0x360] ss:$8 sps:$4 sm:$0xff]  }
 0x15a   :  { %v450_v34 = vadd.f32 1.0, %v442_v32  ;;  %v437_v35 = vmul.bf16 1069105081, %v414_v33  ;;  %v1979_v32 = vld [vmem:[#allocation8 + $0x180] ss:$8 sps:$4 sm:$0xff]  }
 0x15b   :  { %v1990_v33 = vld [vmem:[#allocation8 + $0x354] ss:$8 sps:$4 sm:$0xff]   ;;  %v2033_v57 = vld [vmem:[#allocation8 + $0x3e0] ss:$8 sps:$4 sm:$0xff]  }
 0x15c   :  { %2069 = vrcp.f32 %v450_v34  ;;  %v405_v34 = vpack.c.bf16 %v393_v30, %v393_v30  ;;  %v2042_v23 = vld [vmem:[#allocation10 + $0x8] sm:$0xff]   ;;  %v2048_v30 = vld [vmem:[#allocation10 + $0x20] sm:$0xff]  }
 0x15d   :  { %v2062_v36 = vpop.eup %2061  ;;  %2071 = vpow.bf16 %v437_v35  ;;  %v1988_v35 = vld [vmem:[#allocation8 + $0x350] ss:$8 sps:$4 sm:$0xff]  }
 0x15e   :  { %v463_v49 = vpack.c.bf16 %v2062_v36, %v2062_v36  ;;  %v1985_v36 = vld [vmem:[#allocation8 + $0x190] ss:$8 sps:$4 sm:$0xff]  }
 0x15f   :  { %v2064_v41 = vpop.eup %2063 }
 0x160   :  { %v2066_v42 = vpop.eup %2065  ;;  %v443_v44 = vunpack.c.l.bf16 %v2064_v41  ;;  %v1996_v41 = vld [vmem:[#allocation8 + $0x364] ss:$8 sps:$4 sm:$0xff]  }
 0x161   :  { %v2068_v43 = vpop.eup %2067  ;;  %v444_v45 = vunpack.c.l.bf16 %v2066_v42  ;;  %v413_v42 = vsub.bf16 0, %v405_v34  ;;  %v2053_v34 = vld [vmem:[#allocation10 + $0x78] sm:$0xff]  }
 0x162   :  { %v464_v46 = vpack.c.bf16 %v2068_v43, %v2068_v43  ;;  %v451_v48 = vadd.f32 1.0, %v443_v44  ;;  %v1993_v43 = vld [vmem:[#allocation8 + $0x1a4] ss:$8 sps:$4 sm:$0xff]   ;;  %v1991_v44 = vld [vmem:[#allocation8 + $0x1a0] ss:$8 sps:$4 sm:$0xff]  }
 0x163   :  { %v452_v51 = vadd.f32 1.0, %v444_v45  ;;  %v2002_v45 = vld [vmem:[#allocation8 + $0x374] ss:$8 sps:$4 sm:$0xff]  }
 0x164   :  { %1283 = vmatprep.mubr.bf16.mxu1 %v464_v46  ;;  %2073 = vrcp.f32 %v451_v48  ;;  %v1999_v48 = vld [vmem:[#allocation8 + $0x1b4] ss:$8 sps:$4 sm:$0xff]  }
 0x165   :  { %1284 = vmatmul.mubr.bf16.vlgmr.msra.gmra.mrb[0].mxu1 %v463_v49  ;;  %2075 = vrcp.f32 %v452_v51  ;;  %v2000_v49 = vld [vmem:[#allocation8 + $0x370] ss:$8 sps:$4 sm:$0xff]  }
 0x166   :  { %1293 = vmatpush1.bf16.msra.mxu1 %v1931_v47  ;;  %v2070_v53 = vpop.eup %2069  ;;  %v434_v47 = vmul.bf16 1069105081, %v413_v42  ;;  %v1997_v51 = vld [vmem:[#allocation8 + $0x1b0] ss:$8 sps:$4 sm:$0xff]  }
 0x167   :  { %1294 = vmatprep.subr.bf16.mxu1 %v1939_v50  ;;  %v466_v56 = vpack.c.bf16 %v2070_v53, %v2070_v53  ;;  %v2005_v53 = vld [vmem:[#allocation8 + $0x1c4] ss:$8 sps:$4 sm:$0xff]  }
 0x168   :  { %v2072_v58 = vpop.eup %2071 }
 0x169   :  { %1324 = vmatprep.mubr.bf16.mxu1 %v466_v56  ;;  %v446_v61 = vunpack.c.l.bf16 %v2072_v58  ;;  %v2003_v56 = vld [vmem:[#allocation8 + $0x1c0] ss:$8 sps:$4 sm:$0xff]   ;;  %v2014_v58 = vld [vmem:[#allocation8 + $0x394] ss:$8 sps:$4 sm:$0xff]  }
 0x16a   :  { %1295 = vmatpush1.bf16.msra.mxu1 %v1937_v52  ;;  %v2008_v52 = vld [vmem:[#allocation8 + $0x384] ss:$8 sps:$4 sm:$0xff]  }
 0x16b   :  { %1296 = vmatprep.subr.bf16.mxu1 %v1945_v54  ;;  %v454_v63 = vadd.f32 1.0, %v446_v61  ;;  %v2006_v54 = vld [vmem:[#allocation8 + $0x380] ss:$8 sps:$4 sm:$0xff]   ;;  %v2009_v61 = vld [vmem:[#allocation8 + $0x1d0] ss:$8 sps:$4 sm:$0xff]  }
 0x16d   :  { %2077 = vrcp.f32 %v454_v63  ;;  %v2017_v63 = vld [vmem:[#allocation8 + $0x1e4] ss:$8 sps:$4 sm:$0xff]  }
 0x16e   :  { %1297 = vmatpush1.bf16.msra.mxu1 %v1943_v59  ;;  %v2074_v1 = vpop.eup %2073  ;;  %2079 = vpow.bf16 %v422_v24  ;;  %v2011_v59 = vld [vmem:[#allocation8 + $0x1d4] ss:$8 sps:$4 sm:$0xff]  }
 0x16f   :  { %1298 = vmatprep.subr.bf16.mxu1 %v1951_v60  ;;  %v2076_v3 = vpop.eup %2075  ;;  %v467_v8 = vpack.c.bf16 %v2074_v1, %v2074_v1  ;;  %2081 = vpow.bf16 %v434_v47  ;;  %v2012_v60 = vld [vmem:[#allocation8 + $0x390] ss:$8 sps:$4 sm:$0xff]  }
 0x170   :  { %v468_v5 = vpack.c.bf16 %v2076_v3, %v2076_v3  ;;  %v2026_v3 = vld [vmem:[#allocation8 + $0x3b4] ss:$8 sps:$4 sm:$0xff]  }
 0x171   :  { %v2043_v24 = vld [vmem:[#allocation10 + $0x50] sm:$0xff]  }
 0x172   :  { %1299 = vmatpush1.bf16.msra.mxu1 %v1949_v0  ;;  %1365 = vmatprep.mubr.bf16.mxu0 %v468_v5  ;;  %v2018_v0 = vld [vmem:[#allocation8 + $0x3a0] ss:$8 sps:$4 sm:$0xff]  }
 0x173   :  { %1300 = vmatprep.subr.bf16.mxu1 %v1957_v2  ;;  %1366 = vmatmul.mubr.bf16.vlgmr.msra.gmra.mrb[16].mxu0 %v467_v8  ;;  %v2015_v2 = vld [vmem:[#allocation8 + $0x1e0] ss:$8 sps:$4 sm:$0xff]   ;;  %v2029_v8 = vld [vmem:[#allocation8 + $0x3c4] ss:$8 sps:$4 sm:$0xff]  }
 0x174   :  { %1375 = vmatpush1.bf16.msra.mxu0 %v1958_v6  ;;  %v2024_v6 = vld [vmem:[#allocation8 + $0x3b0] ss:$8 sps:$4 sm:$0xff]  }
 0x175   :  { %1376 = vmatprep.subr.bf16.mxu0 %v1966_v9 }
 0x176   :  { %1301 = vmatpush1.bf16.msra.mxu1 %v1955_v7  ;;  %v2021_v7 = vld [vmem:[#allocation8 + $0x1f0] ss:$8 sps:$4 sm:$0xff]  }
 0x177   :  { %1302 = vmatprep.subr.bf16.mxu1 %v1963_v10  ;;  %v2078_v17 = vpop.eup %2077 }
 0x178   :  { %1377 = vmatpush1.bf16.msra.mxu0 %v1964_v12  ;;  %v470_v21 = vpack.c.bf16 %v2078_v17, %v2078_v17  ;;  %v2032_v12 = vld [vmem:[#allocation8 + $0x3d4] ss:$8 sps:$4 sm:$0xff]   ;;  %v2036_v17 = vld [vmem:[#allocation8 + $0x3f0] ss:$8 sps:$4 sm:$0xff]  }
 0x179   :  { %1378 = vmatprep.subr.bf16.mxu0 %v1972_v14  ;;  %v2080_v46 = vpop.eup %2079  ;;  %v2030_v14 = vld [vmem:[#allocation8 + $0x3d0] ss:$8 sps:$4 sm:$0xff]  }
 0x17a   :  { %1303 = vmatpush1.bf16.msra.mxu1 %v1961_v13  ;;  %1406 = vmatprep.mubr.bf16.mxu0 %v470_v21  ;;  %v441_v50 = vunpack.c.l.bf16 %v2080_v46  ;;  %v2082_v1 = vpop.eup %2081  ;;  %v2040_v21 = vld [vmem:[#allocation10] sm:$0xff]  }
 0x17b   :  { %1304 = vmatprep.subr.bf16.mxu1 %v1969_v15  ;;  %v445_v5 = vunpack.c.l.bf16 %v2082_v1  ;;  %v2035_v15 = vld [vmem:[#allocation8 + $0x3e4] ss:$8 sps:$4 sm:$0xff]  }
 0x17c   :  { %1379 = vmatpush1.bf16.msra.mxu0 %v1970_v18  ;;  %v449_v55 = vadd.f32 1.0, %v441_v50 }
 0x17d   :  { %1380 = vmatprep.subr.bf16.mxu0 %v1978_v20  ;;  %v453_v10 = vadd.f32 1.0, %v445_v5  ;;  %v2039_v20 = vld [vmem:[#allocation10 + $0x40] sm:$0xff]   ;;  %v1783_v5 = vld [vmem:[%s2424_s6] ss:$0 sm:$0xff]  ;;  %s2209_s6 = scalar_lea.vmem %s1625_s18, 64 }
 0x17e   :  { %1305 = vmatpush1.bf16.msra.mxu1 %v1967_v19  ;;  %2083 = vrcp.f32 %v449_v55  ;;  %p2210_p12 = scmp.ne.s32.totalorder %s1625_s18, %s2209_s6  ;;  %p2215_p0 = scmp.lt.s32.totalorder %s2209_s6, %s2209_s6 }
 0x17f   :  { %1306 = vmatprep.subr.bf16.mxu1 %v1975_v22  ;;  %2085 = vrcp.f32 %v453_v10  ;;  %v2041_v22 = vld [vmem:[#allocation10 + $0x48] sm:$0xff]  }
 0x180   :  { %1381 = vmatpush1.bf16.msra.mxu0 %v1976_v26  ;;  %v2044_v26 = vld [vmem:[#allocation10 + $0x10] sm:$0xff]   ;;  %p2216_p1 = por %p2215_p0, %p2214_p13 }
 0x181   :  { %1382 = vmatprep.subr.bf16.mxu0 %v1984_v28  ;;  %v2046_v28 = vld [vmem:[#allocation10 + $0x18] sm:$0xff]  }
 0x182   :  { %1307 = vmatpush1.bf16.msra.mxu1 %v1973_v27  ;;  %v2045_v27 = vld [vmem:[#allocation10 + $0x58] sm:$0xff]   ;;  %p2217_p2 = pnand %p2216_p1, %p2210_p12 }
 0x183   :  { %1308 = vmatprep.subr.bf16.mxu1 %v1981_v29  ;;  %v2047_v29 = vld [vmem:[#allocation10 + $0x60] sm:$0xff]  }
 0x184   :  { %1383 = vmatpush1.bf16.msra.mxu0 %v1982_v31  ;;  %v2049_v31 = vld [vmem:[#allocation10 + $0x68] sm:$0xff]  }
 0x185   :  { %1384 = vmatprep.subr.bf16.mxu0 %v1990_v33  ;;  %v2051_v33 = vld [vmem:[#allocation10 + $0x70] sm:$0xff]  }
 0x186   :  { %1309 = vmatpush1.bf16.msra.mxu1 %v1979_v32  ;;  %v2050_v32 = vld [vmem:[#allocation10 + $0x28] sm:$0xff]  }
 0x187   :  { %1310 = vmatprep.subr.bf16.mxu1 %v1987_v39  ;;  %v2052_v39 = vld [vmem:[#allocation10 + $0x30] sm:$0xff]  }
 0x188   :  { %1385 = vmatpush1.bf16.msra.mxu0 %v1988_v35  ;;  %v2084_v9 = vpop.eup %2083  ;;  %v2054_v35 = vld [vmem:[#allocation10 + $0x38] sm:$0xff]  }
 0x189   :  { %1386 = vmatprep.subr.bf16.mxu0 %v1996_v41  ;;  %v465_v13 = vpack.c.bf16 %v2084_v9, %v2084_v9  ;;  %v2086_v18 = vpop.eup %2085 }
 0x18a   :  { %1311 = vmatpush1.bf16.msra.mxu1 %v1985_v36  ;;  %v469_v19 = vpack.c.bf16 %v2086_v18, %v2086_v18 }
 0x18b   :  { %1312 = vmatprep.subr.bf16.mxu1 %v1993_v43 }
 0x18c   :  { %1387 = vmatpush1.bf16.msra.mxu0 %v1994_v25  ;;  %v599_v25 = vld [vmem:[%s2422_s4] sm:$0x3] }
 0x18d   :  { %1388 = vmatprep.subr.bf16.mxu0 %v2002_v45  ;;  %v608_v45 = vrot.slane %v599_v25, %v117_v40 }
 0x18e   :  { %1313 = vmatpush1.bf16.msra.mxu1 %v1991_v44  ;;  %v604_v44 = vrot.slane %v599_v25, %v113_v38 }
 0x18f   :  { %1314 = vmatprep.subr.bf16.mxu1 %v1999_v48 }
 0x190   :  { %1389 = vmatpush1.bf16.msra.mxu0 %v2000_v49 }
 0x191   :  { %1390 = vmatprep.subr.bf16.mxu0 %v2008_v52 }
 0x192   :  { %1315 = vmatpush1.bf16.msra.mxu1 %v1997_v51 }
 0x193   :  { %1316 = vmatprep.subr.bf16.mxu1 %v2005_v53 }
 0x194   :  { %1391 = vmatpush1.bf16.msra.mxu0 %v2006_v54 }
 0x195   :  { %1392 = vmatprep.subr.bf16.mxu0 %v2014_v58 }
 0x196   :  { %1317 = vmatpush1.bf16.msra.mxu1 %v2003_v56 }
 0x197   :  { %1318 = vmatprep.subr.bf16.mxu1 %v2011_v59 }
 0x198   :  { %1393 = vmatpush1.bf16.msra.mxu0 %v2012_v60 }
 0x199   :  { %1394 = vmatprep.subr.bf16.mxu0 %v2020_v62 }
 0x19a   :  { %1319 = vmatpush1.bf16.msra.mxu1 %v2009_v61 }
 0x19b   :  { %1320 = vmatprep.subr.bf16.mxu1 %v2017_v63 }
 0x19c   :  { %1395 = vmatpush1.bf16.msra.mxu0 %v2018_v0 }
 0x19d   :  { %1396 = vmatprep.subr.bf16.mxu0 %v2026_v3 }
 0x19e   :  { %1321 = vmatpush1.bf16.msra.mxu1 %v2015_v2 }
 0x19f   :  { %1322 = vmatprep.subr.bf16.mxu1 %v2023_v4 }
 0x1a0   :  { %1397 = vmatpush1.bf16.msra.mxu0 %v2024_v6 }
 0x1a1   :  { %1398 = vmatprep.subr.bf16.mxu0 %v2029_v8 }
 0x1a2   :  { %1323 = vmatpush1.bf16.msra.mxu1 %v2021_v7 }
 0x1a3   :  { %1800 = vmatprep.subr.bf16.mxu1 %v2039_v20 }
 0x1a4   :  { %1399 = vmatpush1.bf16.msra.mxu0 %v2027_v11 }
 0x1a5   :  { %1325 = vmatmul.mubr.bf16.vlgmr.msra.gmra.mrb[0].mxu1 %v465_v13  ;;  %1400 = vmatprep.subr.bf16.mxu0 %v2032_v12 }
 0x1a6   :  { %1801 = vmatpush3.bf16.msra.mxu1 %v2040_v21 }
 0x1a7   :  { %1802 = vmatprep.subr.bf16.mxu1 %v2041_v22 }
 0x1a8   :  { %1401 = vmatpush1.bf16.msra.mxu0 %v2030_v14 }
 0x1a9   :  { %1402 = vmatprep.subr.bf16.mxu0 %v2035_v15 }
 0x1aa   :  { %1803 = vmatpush3.bf16.msra.mxu1 %v2042_v23 }
 0x1ab   :  { %1804 = vmatprep.subr.bf16.mxu1 %v2043_v24 }
 0x1ac   :  { %1403 = vmatpush1.bf16.msra.mxu0 %v2033_v57 }
 0x1ad   :  { %1404 = vmatprep.subr.bf16.mxu0 %v2038_v16 }
 0x1ae   :  { %1805 = vmatpush3.bf16.msra.mxu1 %v2044_v26 }
 0x1af   :  { %1806 = vmatprep.subr.bf16.mxu1 %v2045_v27 }
 0x1b0   :  { %1405 = vmatpush1.bf16.msra.mxu0 %v2036_v17 }
 0x1b2   :  { %1807 = vmatpush3.bf16.msra.mxu1 %v2046_v28 }
 0x1b3   :  { %1407 = vmatmul.mubr.bf16.vlgmr.msra.gmra.mrb[16].mxu0 %v469_v19  ;;  %1808 = vmatprep.subr.bf16.mxu1 %v2047_v29 }
 0x1b6   :  { %1809 = vmatpush3.bf16.msra.mxu1 %v2048_v30 }
 0x1b7   :  { %1810 = vmatprep.subr.bf16.mxu1 %v2049_v31 }
 0x1ba   :  { %1811 = vmatpush3.bf16.msra.mxu1 %v2050_v32 }
 0x1bb   :  { %1812 = vmatprep.subr.bf16.mxu1 %v2051_v33 }
 0x1be   :  { %1813 = vmatpush3.bf16.msra.mxu1 %v2052_v39 }
 0x1bf   :  { %1814 = vmatprep.subr.bf16.mxu1 %v2053_v34 }
 0x1c2   :  { %1815 = vmatpush3.bf16.msra.mxu1 %v2054_v35 }
 0x278   :  { %v1326_v36 = vpop.f32.mrb[0].mxu1 }
 0x279   :  { %v1328_v41 = vpop.f32.mrb[1].mxu1  ;;  %v1822_v46 = vadd.f32 %v1326_v36, %v604_v44 }
 0x27a   :  { %v1330_v42 = vpop.f32.mrb[2].mxu1  ;;  %v1824_v47 = vadd.f32 %v1328_v41, %v608_v45 }
 0x27b   :  { %v1331_v43 = vpop.f32.mrb[3].mxu1 }
 0x286   :  { %v1408_v48 = vpop.f32.mrb[16].mxu0 }
 0x287   :  { %v1823_v49 = vadd.f32 %v1822_v46, %v1408_v48  ;;  %v1410_v50 = vpop.f32.mrb[17].mxu0 }
 0x288   :  { %v1825_v51 = vadd.f32 %v1824_v47, %v1410_v50  ;;  %v1412_v52 = vpop.f32.mrb[18].mxu0 }
 0x289   :  { %v1415_v53 = vpack.c.bf16 %v1823_v49, %v1823_v49  ;;  %v1413_v54 = vpop.f32.mrb[19].mxu0 }
 0x28a   :  { %v1416_v55 = vpack.c.bf16 %v1825_v51, %v1825_v51 }
 0x28b   :  { %v1417_v56 = vsub.bf16 0, %v1415_v53 }
 0x28c   :  { %v1418_v58 = vsub.bf16 0, %v1416_v55 }
 0x28d   :  { %v1420_v59 = vmul.bf16 1069105081, %v1417_v56 }
 0x28e   :  { %v1423_v60 = vmul.bf16 1069105081, %v1418_v58 }
 0x28f   :  { %2087 = vpow.bf16 %v1420_v59 }
 0x290   :  { %2089 = vpow.bf16 %v1423_v60 }
 0x29a   :  { %v2088_v38 = vpop.eup %2087 }
 0x29b   :  { %v2090_v61 = vpop.eup %2089  ;;  %v1425_v37 = vunpack.c.l.bf16 %v2088_v38 }
 0x29c   :  { %v1426_v40 = vunpack.c.l.bf16 %v2090_v61 }
 0x29d   :  { %v1427_v62 = vadd.f32 1.0, %v1425_v37 }
 0x29e   :  { %v1428_v63 = vadd.f32 1.0, %v1426_v40 }
 0x29f   :  { %2091 = vrcp.f32 %v1427_v62 }
 0x2a0   :  { %2093 = vrcp.f32 %v1428_v63 }
 0x2a9   :  { %v2092_v0 = vpop.eup %2091 }
 0x2aa   :  { %v2094_v1 = vpop.eup %2093  ;;  %v1431_v3 = vpack.c.bf16 %v2092_v0, %v2092_v0 }
 0x2ab   :  { %v1432_v2 = vpack.c.bf16 %v2094_v1, %v2094_v1 }
 0x2ad   :  { %1600 = vmatprep.mubr.bf16.mxu1 %v1432_v2 }
 0x2ae   :  { %1601 = vmatmul.mubr.bf16.vlgmr.msra.gmra.mrb[4].mxu1 %v1431_v3 }
 0x381   :  { %v1816_v4 = vpop.f32.mrb[4].mxu1 }
 0x382   :  { %v1817_v6 = vpop.f32.mrb[5].mxu1 }
 0x383   :  { %v1818_v7 = vadd.f32 %v1817_v6, %v1816_v4  ;;  %v1819_v8 = vpop.f32.mrb[6].mxu1 }
 0x384   :  { %v1820_v9 = vpop.f32.mrb[7].mxu1 }
 0x385   :  { %v1603_v10 = vadd.f32 %v1818_v7, %v1783_v5 }
 0x387   :  { %v1608_v11 = vpack.c.bf16 %v1603_v10, %v1603_v10 }
 0x389   :  { %v1609_v12 = vsub.bf16 0, %v1608_v11 }
 0x38b   :  { %v1611_v13 = vmul.bf16 1069105081, %v1609_v12 }
 0x38d   :  { %2095 = vpow.bf16 %v1611_v13 }
 0x398   :  { %v2096_v14 = vpop.eup %2095 }
 0x399   :  { %v1613_v15 = vunpack.c.l.bf16 %v2096_v14 }
 0x39b   :  { %v1614_v57 = vadd.f32 1.0, %v1613_v15 }
 0x39d   :  { %2097 = vrcp.f32 %v1614_v57 }
 0x3a7   :  { %v2098_v16 = vpop.eup %2097 }
 0x3a8   :  { %v1616_v17 = vpack.c.bf16 %v2098_v16, %v2098_v16 }
 0x3aa   :  { %1617 = vst [vmem:[#allocation11] sm:$0xf] %v1616_v17 }
 0x3ab   :  { %2220 = shalt.err (!%p2217_p2)
}
 0x3ac   :  { %s2221_s21 = scalar_lea.hbm %s2425_s7, 64 }
 0x3ad   :  { %p2222_p3 = scmp.ne.s32.totalorder %s2425_s7, %s2221_s21  ;;  %p2225_p4 = scmp.lt.u32.totalorder %s2221_s21, %s2425_s7 }
 0x3af   :  { %p2227_p5 = pnand %p2225_p4, %p2222_p3 }
 0x3b1   :  { %2230 = shalt.err (!%p2227_p5)
}
 0x3b2   :  { %1627 = dma.vmem_to_hbm [thread:$0]  %s1625_s18, 64, %s2425_s7, [#allocation4]  }
 0x3b3   :  { %2237 = dma.done.wait [#allocation4], 64  }
 0x3b4   :  { %2238 = vsyncadd [#allocation4], 4294967232 }
 0x3b5   :  { %1631 = vsyncpa [#allocation3], 1 }
 0x3b6   :  { %1632 = vsyncpa [#allocation6], 1 }
 0x3b7   :  { %1633 = vsyncpa [#allocation9], 1 }
 0x3b8   :  { %1634 = vsyncpa [#allocation4], 1 }

// kernel: tpu_custom_call.1
= control target key start
LH: loop header
LB: loop body
LE: loop exit
PB: predicated region body
PF: predicated region fallthrough
CT: control target
= control target key end

     0   :  { %12 = vsyncpa [#allocation3], 0  ;;  %s2418_s0 = inlined_call_operand.hbm [shape: bf16[8,32], index: 0, kind: input, shape index: {}]   ;;  %s2419_s1 = inlined_call_operand.hbm [shape: bf16[32,1024], index: 1, kind: input, shape index: {}]   ;;  %s2420_s2 = inlined_call_operand.hbm [shape: f32[1,1024], index: 2, kind: input, shape index: {}]   ;;  %s2421_s3 = inlined_call_operand.hbm [shape: bf16[1024,256], index: 3, kind: input, shape index: {}]   ;;  %s2422_s4 = inlined_call_operand.vmem [shape: f32[1,256], index: 4, kind: input, shape index: {}]   ;;  %s2423_s5 = inlined_call_operand.hbm [shape: bf16[256,128], index: 5, kind: input, shape index: {}]   ;;  %s2424_s6 = inlined_call_operand.vmem [shape: f32[1,128], index: 6, kind: input, shape index: {}]   ;;  %s2425_s7 = inlined_call_operand.hbm [shape: bf16[8,128], index: 7, kind: output, shape index: {}]  }
   0x1   :  { %13 = vsyncpa [#allocation6], 0 }
   0x2   :  { %14 = vsyncpa [#allocation9], 0 }
   0x3   :  { %15 = vsyncpa [#allocation4], 0  ;;  %s2239_s24 = smov [#allocation5]   ;;  %s2099_s28 = scalar_lea.hbm %s2419_s1, 2048 }
   0x4   :  { %s31_s25 = sshll.u32 %s2239_s24, 4  ;;  %p2100_p0 = scmp.ne.s32.totalorder %s2419_s1, %s2099_s28  ;;  %s32_s25 = int_to_ptr.vmem [resolvable:$true] %s31_s25 }
   0x5   :  { %p2103_p1 = scmp.lt.u32.totalorder %s2099_s28, %s2419_s1 }
   0x7   :  { %p2105_p2 = pnand %p2103_p1, %p2100_p0 }
   0x9   :  { %2108 = shalt.err (!%p2105_p2)
}
   0xa   :  { %s2109_s10 = scalar_lea.vmem %s32_s25, 2048  ;;  %p2114_p4 = scmp.lt.s32.totalorder %s32_s25, %s32_s25 }
   0xb   :  { %p2110_p3 = scmp.ne.s32.totalorder %s32_s25, %s2109_s10  ;;  %p2115_p5 = scmp.lt.s32.totalorder %s2109_s10, %s2109_s10 }
   0xd   :  { %p2116_p6 = por %p2115_p5, %p2114_p4 }
   0xf   :  { %p2117_p7 = pnand %p2116_p6, %p2110_p3 }
  0x11   :  { %2120 = shalt.err (!%p2117_p7)
}
  0x12   :  { %s2240_s11 = smov 512   ;;  %s2241_s12 = smov 32  }
  0x13   :  { %37 = dma.hbm_to_vmem [thread:$0]  %s2419_s1, 2048, %s32_s25, [#allocation6], %s2240_s11, %s2240_s11, %s2241_s12  }
  0x14   :  { %s2242_s15 = smov [#allocation8]   ;;  %s2121_s19 = scalar_lea.hbm %s2421_s3, 16384 }
  0x15   :  { %s53_s16 = sshll.u32 %s2242_s15, 4  ;;  %p2122_p8 = scmp.ne.s32.totalorder %s2421_s3, %s2121_s19  ;;  %s54_s16 = int_to_ptr.vmem [resolvable:$true] %s53_s16 }
  0x16   :  { %p2125_p9 = scmp.lt.u32.totalorder %s2121_s19, %s2421_s3 }
  0x18   :  { %p2127_p10 = pnand %p2125_p9, %p2122_p8 }
  0x1a   :  { %2130 = shalt.err (!%p2127_p10)
}
  0x1b   :  { %s2131_s24 = scalar_lea.vmem %s54_s16, 16384  ;;  %p2136_p12 = scmp.lt.s32.totalorder %s54_s16, %s54_s16 }
  0x1c   :  { %p2132_p11 = scmp.ne.s32.totalorder %s54_s16, %s2131_s24  ;;  %p2137_p13 = scmp.lt.s32.totalorder %s2131_s24, %s2131_s24 }
  0x1e   :  { %p2138_p0 = por %p2137_p13, %p2136_p12 }
  0x20   :  { %p2139_p1 = pnand %p2138_p0, %p2132_p11 }
  0x22   :  { %2142 = shalt.err (!%p2139_p1)
}
  0x23   :  { %s2243_s1 = smov 128   ;;  %s2244_s25 = smov 8  }
  0x24   :  { %59 = dma.hbm_to_vmem [thread:$0]  %s2421_s3, 16384, %s54_s16, [#allocation9], %s2243_s1, %s2243_s1, %s2244_s25  }
  0x25   :  { %s2245_s28 = smov [#allocation2]   ;;  %s2246_s30 = smov [#allocation7]  }
  0x26   :  { %s22_s29 = sshll.u32 %s2245_s28, 4  ;;  %s44_s8 = sshll.u32 %s2246_s30, 4  ;;  %s23_s29 = int_to_ptr.vmem [resolvable:$true] %s22_s29  ;;  %s45_s8 = int_to_ptr.vmem [resolvable:$true] %s44_s8 }
  0x27   :  { %s2143_s11 = scalar_lea.hbm %s2418_s0, 64 }
  0x28   :  { %p2144_p2 = scmp.ne.s32.totalorder %s2418_s0, %s2143_s11  ;;  %p2147_p3 = scmp.lt.u32.totalorder %s2143_s11, %s2418_s0 }
  0x2a   :  { %p2149_p4 = pnand %p2147_p3, %p2144_p2 }
  0x2c   :  { %2152 = shalt.err (!%p2149_p4)
}
  0x2d   :  { %s2153_s3 = scalar_lea.vmem %s23_s29, 64  ;;  %p2158_p6 = scmp.lt.s32.totalorder %s23_s29, %s23_s29 }
  0x2e   :  { %p2154_p5 = scmp.ne.s32.totalorder %s23_s29, %s2153_s3  ;;  %p2159_p7 = scmp.lt.s32.totalorder %s2153_s3, %s2153_s3 }
  0x30   :  { %p2160_p8 = por %p2159_p7, %p2158_p6 }
  0x32   :  { %p2161_p9 = pnand %p2160_p8, %p2154_p5 }
  0x34   :  { %2164 = shalt.err (!%p2161_p9)
}
  0x35   :  { %25 = dma.hbm_to_vmem [thread:$0]  %s2418_s0, 64, %s23_s29, [#allocation3]  }
  0x36   :  { %s2165_s20 = scalar_lea.hbm %s2420_s2, 128 }
  0x37   :  { %p2166_p10 = scmp.ne.s32.totalorder %s2420_s2, %s2165_s20  ;;  %p2169_p11 = scmp.lt.u32.totalorder %s2165_s20, %s2420_s2 }
  0x39   :  { %p2171_p12 = pnand %p2169_p11, %p2166_p10 }
  0x3b   :  { %2174 = shalt.err (!%p2171_p12)
}
  0x3c   :  { %s2175_s1 = scalar_lea.vmem %s45_s8, 128  ;;  %p2180_p0 = scmp.lt.s32.totalorder %s45_s8, %s45_s8 }
  0x3d   :  { %p2176_p13 = scmp.ne.s32.totalorder %s45_s8, %s2175_s1  ;;  %p2181_p1 = scmp.lt.s32.totalorder %s2175_s1, %s2175_s1 }
  0x3f   :  { %p2182_p2 = por %p2181_p1, %p2180_p0 }
  0x41   :  { %p2183_p3 = pnand %p2182_p2, %p2176_p13 }
  0x43   :  { %2186 = shalt.err (!%p2183_p3)
}
  0x44   :  { %47 = dma.hbm_to_vmem [thread:$0]  %s2420_s2, 128, %s45_s8, [#allocation6]  }
  0x45   :  { %s2247_s26 = smov [#allocation10]   ;;  %s2187_s30 = scalar_lea.hbm %s2423_s5, 2048 }
  0x46   :  { %s67_s27 = sshll.u32 %s2247_s26, 4  ;;  %p2188_p4 = scmp.ne.s32.totalorder %s2423_s5, %s2187_s30  ;;  %s68_s27 = int_to_ptr.vmem [resolvable:$true] %s67_s27 }
  0x47   :  { %p2191_p5 = scmp.lt.u32.totalorder %s2187_s30, %s2423_s5 }
  0x49   :  { %p2193_p6 = pnand %p2191_p5, %p2188_p4 }
  0x4b   :  { %2196 = shalt.err (!%p2193_p6)
}
  0x4c   :  { %s2197_s13 = scalar_lea.vmem %s68_s27, 2048  ;;  %p2202_p8 = scmp.lt.s32.totalorder %s68_s27, %s68_s27 }
  0x4d   :  { %p2198_p7 = scmp.ne.s32.totalorder %s68_s27, %s2197_s13  ;;  %p2203_p9 = scmp.lt.s32.totalorder %s2197_s13, %s2197_s13 }
  0x4f   :  { %p2204_p10 = por %p2203_p9, %p2202_p8 }
  0x51   :  { %p2205_p11 = pnand %p2204_p10, %p2198_p7 }
  0x53   :  { %2208 = shalt.err (!%p2205_p11)
}
  0x54   :  { %s2248_s2 = smov 64   ;;  %s2249_s8 = smov 4  }
  0x55   :  { %73 = dma.hbm_to_vmem [thread:$0]  %s2423_s5, 2048, %s68_s27, [#allocation9], %s2248_s2, %s2248_s2, %s2249_s8  }
  0x56   :  { %2231 = dma.done.wait [#allocation3], 64  }
  0x57   :  { %2232 = vsyncadd [#allocation3], 4294967232 }
  0x58   :  { %2233 = dma.done.wait [#allocation6], 2176  }
  0x59   :  { %2234 = vsyncadd [#allocation6], 4294965120 }
  0x5a   :  { %2235 = dma.done.wait [#allocation9], 18432  }
  0x5b   :  { %2236 = vsyncadd [#allocation9], 4294948864  ;;  %v2250_v0 = vmov 0   ;;  %v93_v1 = vld [vmem:[#allocation5] sm:$0xff]  ;;  %v94_v8 = vld [vmem:[#allocation5 + $0x8] sm:$0xff]  ;;  %vm231_vm0 = vcmask 261120  }
  0x5c   :  { %267 = vmatprep.mubr.bf16.mxu0 %v2250_v0  ;;  %v97_v2 = vld [vmem:[#allocation5 + $0x20] sm:$0xff]  ;;  %v98_v9 = vld [vmem:[#allocation5 + $0x28] sm:$0xff]  ;;  %v2353_v17 = vld [vmem:[#allocation2] sm:$0xf]  ;;  %s2251_s17 = smov [#allocation11]  }
  0x5d   :  { %v101_v3 = vld [vmem:[#allocation5 + $0x40] sm:$0xff]  ;;  %v1636_v4 = vcombine.high %v93_v1, %v97_v2  ;;  %v1635_v5 = vcombine.low %v93_v1, %v97_v2  ;;  %v1638_v11 = vcombine.high %v94_v8, %v98_v9  ;;  %v102_v12 = vld [vmem:[#allocation5 + $0x48] sm:$0xff]  ;;  %v1637_v18 = vcombine.low %v94_v8, %v98_v9  ;;  %v95_v20 = vld [vmem:[#allocation5 + $0x10] sm:$0xff]  ;;  %s1624_s18 = sshll.u32 %s2251_s17, 4  ;;  %s1625_s18 = int_to_ptr.vmem [resolvable:$true] %s1624_s18 }
  0x5e   :  { %v105_v6 = vld [vmem:[#allocation5 + $0x60] sm:$0xff]  ;;  %v106_v13 = vld [vmem:[#allocation5 + $0x68] sm:$0xff]  ;;  %v99_v22 = vld [vmem:[#allocation5 + $0x30] sm:$0xff]  ;;  %p2214_p13 = scmp.lt.s32.totalorder %s1625_s18, %s1625_s18 }
  0x5f   :  { %v1644_v7 = vcombine.high %v101_v3, %v105_v6  ;;  %235 = vmatprep.subr.bf16.mxu0 %v1636_v4  ;;  %v1643_v10 = vcombine.low %v101_v3, %v105_v6  ;;  %v1847_v14 = vld [vmem:[#allocation8 + $0x4] ss:$8 sps:$4 sm:$0xff]   ;;  %v1849_v15 = vld [vmem:[#allocation8] ss:$8 sps:$4 sm:$0xff]   ;;  %v1850_v16 = vld [vmem:[#allocation8 + $0x14] ss:$8 sps:$4 sm:$0xff]   ;;  %v1646_v19 = vcombine.high %v102_v12, %v106_v13  ;;  %v1645_v24 = vcombine.low %v102_v12, %v106_v13 }
  0x60   :  { %236 = vmatpush1.bf16.msra.mxu0 %v1635_v5  ;;  %1251 = vmatprep.subr.bf16.mxu1 %v1847_v14  ;;  %v1852_v21 = vld [vmem:[#allocation8 + $0x10] ss:$8 sps:$4 sm:$0xff]   ;;  %v1853_v23 = vld [vmem:[#allocation8 + $0x24] ss:$8 sps:$4 sm:$0xff]   ;;  %v1640_v26 = vcombine.high %v95_v20, %v99_v22  ;;  %v1855_v28 = vld [vmem:[#allocation8 + $0x20] ss:$8 sps:$4 sm:$0xff]   ;;  %v1639_v30 = vcombine.low %v95_v20, %v99_v22 }
  0x61   :  { %237 = vmatprep.subr.bf16.mxu0 %v1644_v7  ;;  %1252 = vmatpush1.bf16.msra.mxu1 %v1849_v15  ;;  %v103_v25 = vld [vmem:[#allocation5 + $0x50] sm:$0xff]  ;;  %v1856_v29 = vld [vmem:[#allocation8 + $0x34] ss:$8 sps:$4 sm:$0xff]   ;;  %v1858_v32 = vld [vmem:[#allocation8 + $0x30] ss:$8 sps:$4 sm:$0xff]  }
  0x62   :  { %1253 = vmatprep.subr.bf16.mxu1 %v1850_v16  ;;  %v107_v27 = vld [vmem:[#allocation5 + $0x70] sm:$0xff]  ;;  %v96_v33 = vld [vmem:[#allocation5 + $0x18] sm:$0xff] }
  0x63   :  { %v1648_v31 = vcombine.high %v103_v25, %v107_v27  ;;  %v100_v34 = vld [vmem:[#allocation5 + $0x38] sm:$0xff]  ;;  %v1859_v35 = vld [vmem:[#allocation8 + $0x44] ss:$8 sps:$4 sm:$0xff]   ;;  %v1864_v36 = vld [vmem:[#allocation8 + $0x40] ss:$8 sps:$4 sm:$0xff]   ;;  %v1647_v37 = vcombine.low %v103_v25, %v107_v27 }
  0x64   :  { %238 = vmatpush1.bf16.msra.mxu0 %v1643_v10  ;;  %v104_v38 = vld [vmem:[#allocation5 + $0x58] sm:$0xff]  ;;  %v1642_v41 = vcombine.high %v96_v33, %v100_v34  ;;  %v1641_v43 = vcombine.low %v96_v33, %v100_v34  ;;  %v1871_v44 = vld [vmem:[#allocation8 + $0x64] ss:$8 sps:$4 sm:$0xff]   ;;  %v1861_v48 = vld [vmem:[#allocation8 + $0x200] ss:$8 sps:$4 sm:$0xff]  }
  0x65   :  { %276 = vmatprep.subr.bf16.mxu0 %v1638_v11  ;;  %1254 = vmatpush1.bf16.msra.mxu1 %v1852_v21  ;;  %v108_v39 = vld [vmem:[#allocation5 + $0x78] sm:$0xff]  ;;  %v1863_v46 = vld [vmem:[#allocation8 + $0x204] ss:$8 sps:$4 sm:$0xff]   ;;  %v1873_v52 = vld [vmem:[#allocation8 + $0x220] ss:$8 sps:$4 sm:$0xff]  }
  0x66   :  { %1255 = vmatprep.subr.bf16.mxu1 %v1853_v23  ;;  %v1865_v40 = vld [vmem:[#allocation8 + $0x54] ss:$8 sps:$4 sm:$0xff]   ;;  %v1870_v42 = vld [vmem:[#allocation8 + $0x50] ss:$8 sps:$4 sm:$0xff]   ;;  %v1650_v45 = vcombine.high %v104_v38, %v108_v39  ;;  %v1649_v47 = vcombine.low %v104_v38, %v108_v39  ;;  %v1875_v51 = vld [vmem:[#allocation8 + $0x224] ss:$8 sps:$4 sm:$0xff]  }
  0x67   :  { %1651 = vmatmul.mubr.msk.bf16.vlgmr.msra.gmra.mrb[0].mxu0 %vm231_vm0, %v2353_v17  ;;  %v1869_v49 = vld [vmem:[#allocation8 + $0x214] ss:$8 sps:$4 sm:$0xff]   ;;  %v1867_v50 = vld [vmem:[#allocation8 + $0x210] ss:$8 sps:$4 sm:$0xff]   ;;  %v1876_v53 = vld [vmem:[#allocation8 + $0x60] ss:$8 sps:$4 sm:$0xff]  }
  0x68   :  { %277 = vmatpush1.bf16.msra.mxu0 %v1637_v18  ;;  %308 = vmatprep.mubr.bf16.mxu0 %v2250_v0  ;;  %v1877_v54 = vld [vmem:[#allocation8 + $0x74] ss:$8 sps:$4 sm:$0xff]   ;;  %v1879_v56 = vld [vmem:[#allocation8 + $0x230] ss:$8 sps:$4 sm:$0xff]   ;;  %v1883_v58 = vld [vmem:[#allocation8 + $0x84] ss:$8 sps:$4 sm:$0xff]  }
  0x69   :  { %278 = vmatprep.subr.bf16.mxu0 %v1646_v19  ;;  %1256 = vmatpush1.bf16.msra.mxu1 %v1855_v28  ;;  %v1881_v55 = vld [vmem:[#allocation8 + $0x234] ss:$8 sps:$4 sm:$0xff]   ;;  %v1882_v57 = vld [vmem:[#allocation8 + $0x70] ss:$8 sps:$4 sm:$0xff]   ;;  %v1887_v59 = vld [vmem:[#allocation8 + $0x244] ss:$8 sps:$4 sm:$0xff]  }
  0x6a   :  { %1257 = vmatprep.subr.bf16.mxu1 %v1856_v29  ;;  %v1885_v60 = vld [vmem:[#allocation8 + $0x240] ss:$8 sps:$4 sm:$0xff]   ;;  %v1889_v62 = vld [vmem:[#allocation8 + $0x94] ss:$8 sps:$4 sm:$0xff]   ;;  %v1894_v1 = vld [vmem:[#allocation8 + $0x90] ss:$8 sps:$4 sm:$0xff]  }
  0x6b   :  { %v1888_v61 = vld [vmem:[#allocation8 + $0x80] ss:$8 sps:$4 sm:$0xff]   ;;  %v1893_v63 = vld [vmem:[#allocation8 + $0x254] ss:$8 sps:$4 sm:$0xff]   ;;  %v1895_v2 = vld [vmem:[#allocation8 + $0xa4] ss:$8 sps:$4 sm:$0xff]  }
  0x6c   :  { %279 = vmatpush1.bf16.msra.mxu0 %v1645_v24  ;;  %v1899_v3 = vld [vmem:[#allocation8 + $0x264] ss:$8 sps:$4 sm:$0xff]   ;;  %v1897_v4 = vld [vmem:[#allocation8 + $0x260] ss:$8 sps:$4 sm:$0xff]   ;;  %v1901_v6 = vld [vmem:[#allocation8 + $0xb4] ss:$8 sps:$4 sm:$0xff]  }
  0x6d   :  { %317 = vmatprep.subr.bf16.mxu0 %v1640_v26  ;;  %1258 = vmatpush1.bf16.msra.mxu1 %v1858_v32  ;;  %v1900_v5 = vld [vmem:[#allocation8 + $0xa0] ss:$8 sps:$4 sm:$0xff]   ;;  %v1905_v7 = vld [vmem:[#allocation8 + $0x274] ss:$8 sps:$4 sm:$0xff]   ;;  %v1903_v8 = vld [vmem:[#allocation8 + $0x270] ss:$8 sps:$4 sm:$0xff]  }
  0x6e   :  { %1259 = vmatprep.subr.bf16.mxu1 %v1859_v35  ;;  %v1906_v9 = vld [vmem:[#allocation8 + $0xb0] ss:$8 sps:$4 sm:$0xff]   ;;  %v1907_v10 = vld [vmem:[#allocation8 + $0xc4] ss:$8 sps:$4 sm:$0xff]   ;;  %v1909_v12 = vld [vmem:[#allocation8 + $0x280] ss:$8 sps:$4 sm:$0xff]  }
  0x6f   :  { %1652 = vmatmul.mubr.msk.bf16.vlgmr.msra.gmra.mrb[4].mxu0 %vm231_vm0, %v2353_v17  ;;  %v1911_v11 = vld [vmem:[#allocation8 + $0x284] ss:$8 sps:$4 sm:$0xff]   ;;  %v1912_v13 = vld [vmem:[#allocation8 + $0xc0] ss:$8 sps:$4 sm:$0xff]   ;;  %v1913_v14 = vld [vmem:[#allocation8 + $0xd4] ss:$8 sps:$4 sm:$0xff]  }
  0x70   :  { %318 = vmatpush1.bf16.msra.mxu0 %v1639_v30  ;;  %349 = vmatprep.mubr.bf16.mxu0 %v2250_v0  ;;  %v1917_v15 = vld [vmem:[#allocation8 + $0x294] ss:$8 sps:$4 sm:$0xff]   ;;  %v1915_v16 = vld [vmem:[#allocation8 + $0x290] ss:$8 sps:$4 sm:$0xff]   ;;  %v1919_v18 = vld [vmem:[#allocation8 + $0xe4] ss:$8 sps:$4 sm:$0xff]  }
  0x71   :  { %319 = vmatprep.subr.bf16.mxu0 %v1648_v31  ;;  %1260 = vmatpush1.bf16.msra.mxu1 %v1864_v36  ;;  %v1923_v19 = vld [vmem:[#allocation8 + $0x2a4] ss:$8 sps:$4 sm:$0xff]   ;;  %v1921_v20 = vld [vmem:[#allocation8 + $0x2a0] ss:$8 sps:$4 sm:$0xff]   ;;  %v1925_v22 = vld [vmem:[#allocation8 + $0xf4] ss:$8 sps:$4 sm:$0xff]   ;;  %v111_v36 = vlaneseq }
  0x72   :  { %1261 = vmatprep.subr.bf16.mxu1 %v1865_v40  ;;  %v1924_v21 = vld [vmem:[#allocation8 + $0xe0] ss:$8 sps:$4 sm:$0xff]   ;;  %v1929_v23 = vld [vmem:[#allocation8 + $0x2b4] ss:$8 sps:$4 sm:$0xff]   ;;  %v1927_v24 = vld [vmem:[#allocation8 + $0x2b0] ss:$8 sps:$4 sm:$0xff]  }
  0x73   :  { %v1930_v25 = vld [vmem:[#allocation8 + $0xf0] ss:$8 sps:$4 sm:$0xff]   ;;  %v1933_v26 = vld [vmem:[#allocation8 + $0x104] ss:$8 sps:$4 sm:$0xff]   ;;  %v1934_v28 = vld [vmem:[#allocation8 + $0x2c0] ss:$8 sps:$4 sm:$0xff]  }
  0x74   :  { %320 = vmatpush1.bf16.msra.mxu0 %v1647_v37  ;;  %v1936_v27 = vld [vmem:[#allocation8 + $0x2c4] ss:$8 sps:$4 sm:$0xff]   ;;  %v1940_v29 = vld [vmem:[#allocation8 + $0x2d0] ss:$8 sps:$4 sm:$0xff]   ;;  %v1942_v30 = vld [vmem:[#allocation8 + $0x2d4] ss:$8 sps:$4 sm:$0xff]  }
  0x75   :  { %358 = vmatprep.subr.bf16.mxu0 %v1642_v41  ;;  %1262 = vmatpush1.bf16.msra.mxu1 %v1870_v42  ;;  %v1946_v31 = vld [vmem:[#allocation8 + $0x2e0] ss:$8 sps:$4 sm:$0xff]   ;;  %v1948_v32 = vld [vmem:[#allocation8 + $0x2e4] ss:$8 sps:$4 sm:$0xff]   ;;  %v1952_v33 = vld [vmem:[#allocation8 + $0x2f0] ss:$8 sps:$4 sm:$0xff]  }
  0x76   :  { %1263 = vmatprep.subr.bf16.mxu1 %v1871_v44  ;;  %v1954_v34 = vld [vmem:[#allocation8 + $0x2f4] ss:$8 sps:$4 sm:$0xff]   ;;  %v1960_v35 = vld [vmem:[#allocation8 + $0x304] ss:$8 sps:$4 sm:$0xff]   ;;  %v2366_v37 = vshrl.u32 %v111_v36, 7 }
  0x77   :  { %1653 = vmatmul.mubr.msk.bf16.vlgmr.msra.gmra.mrb[8].mxu0 %vm231_vm0, %v2353_v17  ;;  %v2369_v39 = vld [vmem:[#allocation7] sm:$0xff] }
  0x78   :  { %359 = vmatpush1.bf16.msra.mxu0 %v1641_v43  ;;  %390 = vmatprep.mubr.bf16.mxu0 %v2250_v0  ;;  %v1891_v0 = vld [vmem:[#allocation8 + $0x250] ss:$8 sps:$4 sm:$0xff]   ;;  %v113_v38 = vsub.s32 0, %v2366_v37  ;;  %v117_v40 = vsub.s32 1, %v2366_v37 }
  0x79   :  { %360 = vmatprep.subr.bf16.mxu0 %v1650_v45  ;;  %1264 = vmatpush1.bf16.msra.mxu1 %v1876_v53 }
  0x7a   :  { %1265 = vmatprep.subr.bf16.mxu1 %v1877_v54  ;;  %v114_v41 = vrot.slane %v2369_v39, %v113_v38  ;;  %v118_v42 = vrot.slane %v2369_v39, %v117_v40 }
  0x7c   :  { %361 = vmatpush1.bf16.msra.mxu0 %v1649_v47 }
  0x7d   :  { %1333 = vmatprep.subr.bf16.mxu0 %v1863_v46  ;;  %1266 = vmatpush1.bf16.msra.mxu1 %v1882_v57 }
  0x7e   :  { %1267 = vmatprep.subr.bf16.mxu1 %v1883_v58 }
  0x7f   :  { %1654 = vmatmul.mubr.msk.bf16.vlgmr.msra.gmra.mrb[12].mxu0 %vm231_vm0, %v2353_v17  ;;  %v1918_v17 = vld [vmem:[#allocation8 + $0xd0] ss:$8 sps:$4 sm:$0xff]  }
  0x80   :  { %1334 = vmatpush1.bf16.msra.mxu0 %v1861_v48  ;;  %v125_v48 = vsub.s32 3, %v2366_v37 }
  0x81   :  { %1335 = vmatprep.subr.bf16.mxu0 %v1869_v49  ;;  %1268 = vmatpush1.bf16.msra.mxu1 %v1888_v61 }
  0x82   :  { %1269 = vmatprep.subr.bf16.mxu1 %v1889_v62  ;;  %v126_v54 = vrot.slane %v2369_v39, %v125_v48  ;;  %v133_v62 = vsub.s32 5, %v2366_v37 }
  0x84   :  { %1336 = vmatpush1.bf16.msra.mxu0 %v1867_v50 }
  0x85   :  { %1337 = vmatprep.subr.bf16.mxu0 %v1875_v51  ;;  %1270 = vmatpush1.bf16.msra.mxu1 %v1894_v1 }
  0x86   :  { %1271 = vmatprep.subr.bf16.mxu1 %v1895_v2 }
  0x88   :  { %1338 = vmatpush1.bf16.msra.mxu0 %v1873_v52 }
  0x89   :  { %1339 = vmatprep.subr.bf16.mxu0 %v1881_v55  ;;  %1272 = vmatpush1.bf16.msra.mxu1 %v1900_v5 }
  0x8a   :  { %1273 = vmatprep.subr.bf16.mxu1 %v1901_v6 }
  0x8c   :  { %1340 = vmatpush1.bf16.msra.mxu0 %v1879_v56 }
  0x8d   :  { %1341 = vmatprep.subr.bf16.mxu0 %v1887_v59  ;;  %1274 = vmatpush1.bf16.msra.mxu1 %v1906_v9  ;;  %v129_v59 = vsub.s32 4, %v2366_v37 }
  0x8e   :  { %1275 = vmatprep.subr.bf16.mxu1 %v1907_v10  ;;  %v141_v10 = vsub.s32 7, %v2366_v37 }
  0x8f   :  { %v130_v1 = vrot.slane %v2369_v39, %v129_v59  ;;  %v1943_v59 = vld [vmem:[#allocation8 + $0x120] ss:$8 sps:$4 sm:$0xff]  }
  0x90   :  { %1342 = vmatpush1.bf16.msra.mxu0 %v1885_v60 }
  0x91   :  { %1343 = vmatprep.subr.bf16.mxu0 %v1893_v63  ;;  %1276 = vmatpush1.bf16.msra.mxu1 %v1912_v13 }
  0x92   :  { %1277 = vmatprep.subr.bf16.mxu1 %v1913_v14 }
  0x94   :  { %1344 = vmatpush1.bf16.msra.mxu0 %v1891_v0 }
  0x95   :  { %1345 = vmatprep.subr.bf16.mxu0 %v1899_v3  ;;  %1278 = vmatpush1.bf16.msra.mxu1 %v1918_v17  ;;  %v134_v3 = vrot.slane %v2369_v39, %v133_v62 }
  0x96   :  { %1279 = vmatprep.subr.bf16.mxu1 %v1919_v18 }
  0x98   :  { %1346 = vmatpush1.bf16.msra.mxu0 %v1897_v4 }
  0x99   :  { %1347 = vmatprep.subr.bf16.mxu0 %v1905_v7  ;;  %1280 = vmatpush1.bf16.msra.mxu1 %v1924_v21 }
  0x9a   :  { %1281 = vmatprep.subr.bf16.mxu1 %v1925_v22 }
  0x9c   :  { %1348 = vmatpush1.bf16.msra.mxu0 %v1903_v8 }
  0x9d   :  { %1349 = vmatprep.subr.bf16.mxu0 %v1911_v11  ;;  %1282 = vmatpush1.bf16.msra.mxu1 %v1930_v25 }
  0x9e   :  { %1292 = vmatprep.subr.bf16.mxu1 %v1933_v26 }
  0xa0   :  { %1350 = vmatpush1.bf16.msra.mxu0 %v1909_v12 }
  0xa1   :  { %1351 = vmatprep.subr.bf16.mxu0 %v1917_v15 }
  0xa4   :  { %1352 = vmatpush1.bf16.msra.mxu0 %v1915_v16 }
  0xa5   :  { %1353 = vmatprep.subr.bf16.mxu0 %v1923_v19 }
  0xa8   :  { %1354 = vmatpush1.bf16.msra.mxu0 %v1921_v20  ;;  %v142_v20 = vrot.slane %v2369_v39, %v141_v10  ;;  %v1963_v10 = vld [vmem:[#allocation8 + $0x154] ss:$8 sps:$4 sm:$0xff]  }
  0xa9   :  { %1355 = vmatprep.subr.bf16.mxu0 %v1929_v23 }
  0xac   :  { %1356 = vmatpush1.bf16.msra.mxu0 %v1927_v24 }
  0xad   :  { %1357 = vmatprep.subr.bf16.mxu0 %v1936_v27 }
  0xb0   :  { %1358 = vmatpush1.bf16.msra.mxu0 %v1934_v28 }
  0xb1   :  { %1359 = vmatprep.subr.bf16.mxu0 %v1942_v30 }
  0xb4   :  { %1360 = vmatpush1.bf16.msra.mxu0 %v1940_v29 }
  0xb5   :  { %1361 = vmatprep.subr.bf16.mxu0 %v1948_v32 }
  0xb8   :  { %1362 = vmatpush1.bf16.msra.mxu0 %v1946_v31 }
  0xb9   :  { %1363 = vmatprep.subr.bf16.mxu0 %v1954_v34 }
  0xbc   :  { %1364 = vmatpush1.bf16.msra.mxu0 %v1952_v33 }
  0xbd   :  { %1374 = vmatprep.subr.bf16.mxu0 %v1960_v35 }
 0x13a   :  { %v269_v43 = vpop.f32.mrb[0].mxu0 }
 0x13b   :  { %v270_v44 = vadd.f32 %v269_v43, %v114_v41  ;;  %v271_v45 = vpop.f32.mrb[1].mxu0 }
 0x13c   :  { %v272_v46 = vadd.f32 %v271_v45, %v118_v42  ;;  %v273_v47 = vpop.f32.mrb[2].mxu0 }
 0x13d   :  { %v399_v49 = vpack.c.bf16 %v270_v44, %v270_v44  ;;  %v274_v50 = vpop.f32.mrb[3].mxu0  ;;  %v1931_v47 = vld [vmem:[#allocation8 + $0x100] ss:$8 sps:$4 sm:$0xff]  }
 0x13e   :  { %v400_v51 = vpack.c.bf16 %v272_v46, %v272_v46  ;;  %v1939_v50 = vld [vmem:[#allocation8 + $0x114] ss:$8 sps:$4 sm:$0xff]  }
 0x13f   :  { %v407_v52 = vsub.bf16 0, %v399_v49 }
 0x140   :  { %v408_v53 = vsub.bf16 0, %v400_v51 }
 0x141   :  { %v416_v55 = vmul.bf16 1069105081, %v407_v52  ;;  %v1937_v52 = vld [vmem:[#allocation8 + $0x110] ss:$8 sps:$4 sm:$0xff]  }
 0x142   :  { %v419_v56 = vmul.bf16 1069105081, %v408_v53  ;;  %v2380_v57 = vpop.f32.mrb[4].mxu0 }
 0x143   :  { %2055 = vpow.bf16 %v416_v55  ;;  %v312_v58 = vpop.f32.mrb[5].mxu0  ;;  %v121_v55 = vsub.s32 2, %v2366_v37 }
 0x144   :  { %2057 = vpow.bf16 %v419_v56  ;;  %v313_v60 = vadd.f32 %v312_v58, %v126_v54  ;;  %v314_v61 = vpop.f32.mrb[6].mxu0  ;;  %v1945_v54 = vld [vmem:[#allocation8 + $0x124] ss:$8 sps:$4 sm:$0xff]  }
 0x145   :  { %v315_v63 = vpop.f32.mrb[7].mxu0  ;;  %v122_v62 = vrot.slane %v2369_v39, %v121_v55 }
 0x146   :  { %v402_v0 = vpack.c.bf16 %v313_v60, %v313_v60  ;;  %v1951_v60 = vld [vmem:[#allocation8 + $0x134] ss:$8 sps:$4 sm:$0xff]  }
 0x148   :  { %v410_v2 = vsub.bf16 0, %v402_v0  ;;  %v1949_v0 = vld [vmem:[#allocation8 + $0x130] ss:$8 sps:$4 sm:$0xff]  }
 0x14a   :  { %v425_v4 = vmul.bf16 1069105081, %v410_v2  ;;  %v351_v5 = vpop.f32.mrb[8].mxu0  ;;  %v1957_v2 = vld [vmem:[#allocation8 + $0x144] ss:$8 sps:$4 sm:$0xff]  }
 0x14b   :  { %v352_v6 = vadd.f32 %v351_v5, %v130_v1  ;;  %v353_v7 = vpop.f32.mrb[9].mxu0 }
 0x14c   :  { %2059 = vpow.bf16 %v425_v4  ;;  %v354_v8 = vadd.f32 %v353_v7, %v134_v3  ;;  %v355_v9 = vpop.f32.mrb[10].mxu0  ;;  %v311_v4 = vadd.f32 %v2380_v57, %v122_v62  ;;  %v1955_v7 = vld [vmem:[#allocation8 + $0x140] ss:$8 sps:$4 sm:$0xff]   ;;  %v137_v57 = vsub.s32 6, %v2366_v37  ;;  %v2020_v62 = vld [vmem:[#allocation8 + $0x3a4] ss:$8 sps:$4 sm:$0xff]  }
 0x14d   :  { %v403_v11 = vpack.c.bf16 %v352_v6, %v352_v6  ;;  %v356_v12 = vpop.f32.mrb[11].mxu0  ;;  %v1958_v6 = vld [vmem:[#allocation8 + $0x300] ss:$8 sps:$4 sm:$0xff]   ;;  %v1966_v9 = vld [vmem:[#allocation8 + $0x314] ss:$8 sps:$4 sm:$0xff]  }
 0x14e   :  { %v2056_v13 = vpop.eup %2055  ;;  %v404_v14 = vpack.c.bf16 %v354_v8, %v354_v8  ;;  %v1964_v12 = vld [vmem:[#allocation8 + $0x310] ss:$8 sps:$4 sm:$0xff]  }
 0x14f   :  { %v2058_v15 = vpop.eup %2057  ;;  %v439_v16 = vunpack.c.l.bf16 %v2056_v13  ;;  %v411_v17 = vsub.bf16 0, %v403_v11  ;;  %v401_v11 = vpack.c.bf16 %v311_v4, %v311_v4  ;;  %v1961_v13 = vld [vmem:[#allocation8 + $0x150] ss:$8 sps:$4 sm:$0xff]   ;;  %v2023_v4 = vld [vmem:[#allocation8 + $0x1f4] ss:$8 sps:$4 sm:$0xff]  }
 0x150   :  { %v412_v18 = vsub.bf16 0, %v404_v14  ;;  %v440_v19 = vunpack.c.l.bf16 %v2058_v15  ;;  %v1972_v14 = vld [vmem:[#allocation8 + $0x324] ss:$8 sps:$4 sm:$0xff]  }
 0x151   :  { %v447_v21 = vadd.f32 1.0, %v439_v16  ;;  %v428_v22 = vmul.bf16 1069105081, %v411_v17  ;;  %v1969_v15 = vld [vmem:[#allocation8 + $0x164] ss:$8 sps:$4 sm:$0xff]   ;;  %v409_v16 = vsub.bf16 0, %v401_v11 }
 0x152   :  { %v431_v23 = vmul.bf16 1069105081, %v412_v18  ;;  %v448_v24 = vadd.f32 1.0, %v440_v19  ;;  %v2388_v25 = vpop.f32.mrb[12].mxu0  ;;  %v1970_v18 = vld [vmem:[#allocation8 + $0x320] ss:$8 sps:$4 sm:$0xff]  }
 0x153   :  { %2061 = vrcp.f32 %v447_v21  ;;  %v394_v26 = vpop.f32.mrb[13].mxu0  ;;  %v1967_v19 = vld [vmem:[#allocation8 + $0x160] ss:$8 sps:$4 sm:$0xff]  }
 0x154   :  { %2063 = vpow.bf16 %v428_v22  ;;  %v395_v27 = vadd.f32 %v394_v26, %v142_v20  ;;  %v396_v28 = vpop.f32.mrb[14].mxu0  ;;  %v1978_v20 = vld [vmem:[#allocation8 + $0x334] ss:$8 sps:$4 sm:$0xff]   ;;  %v1976_v26 = vld [vmem:[#allocation8 + $0x330] ss:$8 sps:$4 sm:$0xff]  }
 0x155   :  { %2065 = vpow.bf16 %v431_v23  ;;  %v397_v29 = vpop.f32.mrb[15].mxu0  ;;  %v1975_v22 = vld [vmem:[#allocation8 + $0x174] ss:$8 sps:$4 sm:$0xff]   ;;  %v138_v23 = vrot.slane %v2369_v39, %v137_v57  ;;  %v1984_v28 = vld [vmem:[#allocation8 + $0x344] ss:$8 sps:$4 sm:$0xff]  }
 0x156   :  { %2067 = vrcp.f32 %v448_v24  ;;  %v406_v30 = vpack.c.bf16 %v395_v27, %v395_v27  ;;  %v422_v24 = vmul.bf16 1069105081, %v409_v16  ;;  %v1973_v27 = vld [vmem:[#allocation8 + $0x170] ss:$8 sps:$4 sm:$0xff]   ;;  %v1981_v29 = vld [vmem:[#allocation8 + $0x184] ss:$8 sps:$4 sm:$0xff]  }
 0x157   :  { %v2060_v31 = vpop.eup %2059  ;;  %v1987_v39 = vld [vmem:[#allocation8 + $0x194] ss:$8 sps:$4 sm:$0xff]   ;;  %v2027_v11 = vld [vmem:[#allocation8 + $0x3c0] ss:$8 sps:$4 sm:$0xff]  }
 0x158   :  { %v442_v32 = vunpack.c.l.bf16 %v2060_v31  ;;  %v414_v33 = vsub.bf16 0, %v406_v30  ;;  %v393_v30 = vadd.f32 %v2388_v25, %v138_v23  ;;  %v1982_v31 = vld [vmem:[#allocation8 + $0x340] ss:$8 sps:$4 sm:$0xff]   ;;  %v2038_v16 = vld [vmem:[#allocation8 + $0x3f4] ss:$8 sps:$4 sm:$0xff]  }
 0x159   :  { %v1994_v25 = vld [vmem:[#allocation8 + $0x360] ss:$8 sps:$4 sm:$0xff]  }
 0x15a   :  { %v450_v34 = vadd.f32 1.0, %v442_v32  ;;  %v437_v35 = vmul.bf16 1069105081, %v414_v33  ;;  %v1979_v32 = vld [vmem:[#allocation8 + $0x180] ss:$8 sps:$4 sm:$0xff]  }
 0x15b   :  { %v1990_v33 = vld [vmem:[#allocation8 + $0x354] ss:$8 sps:$4 sm:$0xff]   ;;  %v2033_v57 = vld [vmem:[#allocation8 + $0x3e0] ss:$8 sps:$4 sm:$0xff]  }
 0x15c   :  { %2069 = vrcp.f32 %v450_v34  ;;  %v405_v34 = vpack.c.bf16 %v393_v30, %v393_v30  ;;  %v2042_v23 = vld [vmem:[#allocation10 + $0x8] sm:$0xff]   ;;  %v2048_v30 = vld [vmem:[#allocation10 + $0x20] sm:$0xff]  }
 0x15d   :  { %v2062_v36 = vpop.eup %2061  ;;  %2071 = vpow.bf16 %v437_v35  ;;  %v1988_v35 = vld [vmem:[#allocation8 + $0x350] ss:$8 sps:$4 sm:$0xff]  }
 0x15e   :  { %v463_v49 = vpack.c.bf16 %v2062_v36, %v2062_v36  ;;  %v1985_v36 = vld [vmem:[#allocation8 + $0x190] ss:$8 sps:$4 sm:$0xff]  }
 0x15f   :  { %v2064_v41 = vpop.eup %2063 }
 0x160   :  { %v2066_v42 = vpop.eup %2065  ;;  %v443_v44 = vunpack.c.l.bf16 %v2064_v41  ;;  %v1996_v41 = vld [vmem:[#allocation8 + $0x364] ss:$8 sps:$4 sm:$0xff]  }
 0x161   :  { %v2068_v43 = vpop.eup %2067  ;;  %v444_v45 = vunpack.c.l.bf16 %v2066_v42  ;;  %v413_v42 = vsub.bf16 0, %v405_v34  ;;  %v2053_v34 = vld [vmem:[#allocation10 + $0x78] sm:$0xff]  }
 0x162   :  { %v464_v46 = vpack.c.bf16 %v2068_v43, %v2068_v43  ;;  %v451_v48 = vadd.f32 1.0, %v443_v44  ;;  %v1993_v43 = vld [vmem:[#allocation8 + $0x1a4] ss:$8 sps:$4 sm:$0xff]   ;;  %v1991_v44 = vld [vmem:[#allocation8 + $0x1a0] ss:$8 sps:$4 sm:$0xff]  }
 0x163   :  { %v452_v51 = vadd.f32 1.0, %v444_v45  ;;  %v2002_v45 = vld [vmem:[#allocation8 + $0x374] ss:$8 sps:$4 sm:$0xff]  }
 0x164   :  { %1283 = vmatprep.mubr.bf16.mxu1 %v464_v46  ;;  %2073 = vrcp.f32 %v451_v48  ;;  %v1999_v48 = vld [vmem:[#allocation8 + $0x1b4] ss:$8 sps:$4 sm:$0xff]  }
 0x165   :  { %1284 = vmatmul.mubr.bf16.vlgmr.msra.gmra.mrb[0].mxu1 %v463_v49  ;;  %2075 = vrcp.f32 %v452_v51  ;;  %v2000_v49 = vld [vmem:[#allocation8 + $0x370] ss:$8 sps:$4 sm:$0xff]  }
 0x166   :  { %1293 = vmatpush1.bf16.msra.mxu1 %v1931_v47  ;;  %v2070_v53 = vpop.eup %2069  ;;  %v434_v47 = vmul.bf16 1069105081, %v413_v42  ;;  %v1997_v51 = vld [vmem:[#allocation8 + $0x1b0] ss:$8 sps:$4 sm:$0xff]  }
 0x167   :  { %1294 = vmatprep.subr.bf16.mxu1 %v1939_v50  ;;  %v466_v56 = vpack.c.bf16 %v2070_v53, %v2070_v53  ;;  %v2005_v53 = vld [vmem:[#allocation8 + $0x1c4] ss:$8 sps:$4 sm:$0xff]  }
 0x168   :  { %v2072_v58 = vpop.eup %2071 }
 0x169   :  { %1324 = vmatprep.mubr.bf16.mxu1 %v466_v56  ;;  %v446_v61 = vunpack.c.l.bf16 %v2072_v58  ;;  %v2003_v56 = vld [vmem:[#allocation8 + $0x1c0] ss:$8 sps:$4 sm:$0xff]   ;;  %v2014_v58 = vld [vmem:[#allocation8 + $0x394] ss:$8 sps:$4 sm:$0xff]  }
 0x16a   :  { %1295 = vmatpush1.bf16.msra.mxu1 %v1937_v52  ;;  %v2008_v52 = vld [vmem:[#allocation8 + $0x384] ss:$8 sps:$4 sm:$0xff]  }
 0x16b   :  { %1296 = vmatprep.subr.bf16.mxu1 %v1945_v54  ;;  %v454_v63 = vadd.f32 1.0, %v446_v61  ;;  %v2006_v54 = vld [vmem:[#allocation8 + $0x380] ss:$8 sps:$4 sm:$0xff]   ;;  %v2009_v61 = vld [vmem:[#allocation8 + $0x1d0] ss:$8 sps:$4 sm:$0xff]  }
 0x16d   :  { %2077 = vrcp.f32 %v454_v63  ;;  %v2017_v63 = vld [vmem:[#allocation8 + $0x1e4] ss:$8 sps:$4 sm:$0xff]  }
 0x16e   :  { %1297 = vmatpush1.bf16.msra.mxu1 %v1943_v59  ;;  %v2074_v1 = vpop.eup %2073  ;;  %2079 = vpow.bf16 %v422_v24  ;;  %v2011_v59 = vld [vmem:[#allocation8 + $0x1d4] ss:$8 sps:$4 sm:$0xff]  }
 0x16f   :  { %1298 = vmatprep.subr.bf16.mxu1 %v1951_v60  ;;  %v2076_v3 = vpop.eup %2075  ;;  %v467_v8 = vpack.c.bf16 %v2074_v1, %v2074_v1  ;;  %2081 = vpow.bf16 %v434_v47  ;;  %v2012_v60 = vld [vmem:[#allocation8 + $0x390] ss:$8 sps:$4 sm:$0xff]  }
 0x170   :  { %v468_v5 = vpack.c.bf16 %v2076_v3, %v2076_v3  ;;  %v2026_v3 = vld [vmem:[#allocation8 + $0x3b4] ss:$8 sps:$4 sm:$0xff]  }
 0x171   :  { %v2043_v24 = vld [vmem:[#allocation10 + $0x50] sm:$0xff]  }
 0x172   :  { %1299 = vmatpush1.bf16.msra.mxu1 %v1949_v0  ;;  %1365 = vmatprep.mubr.bf16.mxu0 %v468_v5  ;;  %v2018_v0 = vld [vmem:[#allocation8 + $0x3a0] ss:$8 sps:$4 sm:$0xff]  }
 0x173   :  { %1300 = vmatprep.subr.bf16.mxu1 %v1957_v2  ;;  %1366 = vmatmul.mubr.bf16.vlgmr.msra.gmra.mrb[16].mxu0 %v467_v8  ;;  %v2015_v2 = vld [vmem:[#allocation8 + $0x1e0] ss:$8 sps:$4 sm:$0xff]   ;;  %v2029_v8 = vld [vmem:[#allocation8 + $0x3c4] ss:$8 sps:$4 sm:$0xff]  }
 0x174   :  { %1375 = vmatpush1.bf16.msra.mxu0 %v1958_v6  ;;  %v2024_v6 = vld [vmem:[#allocation8 + $0x3b0] ss:$8 sps:$4 sm:$0xff]  }
 0x175   :  { %1376 = vmatprep.subr.bf16.mxu0 %v1966_v9 }
 0x176   :  { %1301 = vmatpush1.bf16.msra.mxu1 %v1955_v7  ;;  %v2021_v7 = vld [vmem:[#allocation8 + $0x1f0] ss:$8 sps:$4 sm:$0xff]  }
 0x177   :  { %1302 = vmatprep.subr.bf16.mxu1 %v1963_v10  ;;  %v2078_v17 = vpop.eup %2077 }
 0x178   :  { %1377 = vmatpush1.bf16.msra.mxu0 %v1964_v12  ;;  %v470_v21 = vpack.c.bf16 %v2078_v17, %v2078_v17  ;;  %v2032_v12 = vld [vmem:[#allocation8 + $0x3d4] ss:$8 sps:$4 sm:$0xff]   ;;  %v2036_v17 = vld [vmem:[#allocation8 + $0x3f0] ss:$8 sps:$4 sm:$0xff]  }
 0x179   :  { %1378 = vmatprep.subr.bf16.mxu0 %v1972_v14  ;;  %v2080_v46 = vpop.eup %2079  ;;  %v2030_v14 = vld [vmem:[#allocation8 + $0x3d0] ss:$8 sps:$4 sm:$0xff]  }
 0x17a   :  { %1303 = vmatpush1.bf16.msra.mxu1 %v1961_v13  ;;  %1406 = vmatprep.mubr.bf16.mxu0 %v470_v21  ;;  %v441_v50 = vunpack.c.l.bf16 %v2080_v46  ;;  %v2082_v1 = vpop.eup %2081  ;;  %v2040_v21 = vld [vmem:[#allocation10] sm:$0xff]  }
 0x17b   :  { %1304 = vmatprep.subr.bf16.mxu1 %v1969_v15  ;;  %v445_v5 = vunpack.c.l.bf16 %v2082_v1  ;;  %v2035_v15 = vld [vmem:[#allocation8 + $0x3e4] ss:$8 sps:$4 sm:$0xff]  }
 0x17c   :  { %1379 = vmatpush1.bf16.msra.mxu0 %v1970_v18  ;;  %v449_v55 = vadd.f32 1.0, %v441_v50 }
 0x17d   :  { %1380 = vmatprep.subr.bf16.mxu0 %v1978_v20  ;;  %v453_v10 = vadd.f32 1.0, %v445_v5  ;;  %v2039_v20 = vld [vmem:[#allocation10 + $0x40] sm:$0xff]   ;;  %v1783_v5 = vld [vmem:[%s2424_s6] ss:$0 sm:$0xff]  ;;  %s2209_s6 = scalar_lea.vmem %s1625_s18, 64 }
 0x17e   :  { %1305 = vmatpush1.bf16.msra.mxu1 %v1967_v19  ;;  %2083 = vrcp.f32 %v449_v55  ;;  %p2210_p12 = scmp.ne.s32.totalorder %s1625_s18, %s2209_s6  ;;  %p2215_p0 = scmp.lt.s32.totalorder %s2209_s6, %s2209_s6 }
 0x17f   :  { %1306 = vmatprep.subr.bf16.mxu1 %v1975_v22  ;;  %2085 = vrcp.f32 %v453_v10  ;;  %v2041_v22 = vld [vmem:[#allocation10 + $0x48] sm:$0xff]  }
 0x180   :  { %1381 = vmatpush1.bf16.msra.mxu0 %v1976_v26  ;;  %v2044_v26 = vld [vmem:[#allocation10 + $0x10] sm:$0xff]   ;;  %p2216_p1 = por %p2215_p0, %p2214_p13 }
 0x181   :  { %1382 = vmatprep.subr.bf16.mxu0 %v1984_v28  ;;  %v2046_v28 = vld [vmem:[#allocation10 + $0x18] sm:$0xff]  }
 0x182   :  { %1307 = vmatpush1.bf16.msra.mxu1 %v1973_v27  ;;  %v2045_v27 = vld [vmem:[#allocation10 + $0x58] sm:$0xff]   ;;  %p2217_p2 = pnand %p2216_p1, %p2210_p12 }
 0x183   :  { %1308 = vmatprep.subr.bf16.mxu1 %v1981_v29  ;;  %v2047_v29 = vld [vmem:[#allocation10 + $0x60] sm:$0xff]  }
 0x184   :  { %1383 = vmatpush1.bf16.msra.mxu0 %v1982_v31  ;;  %v2049_v31 = vld [vmem:[#allocation10 + $0x68] sm:$0xff]  }
 0x185   :  { %1384 = vmatprep.subr.bf16.mxu0 %v1990_v33  ;;  %v2051_v33 = vld [vmem:[#allocation10 + $0x70] sm:$0xff]  }
 0x186   :  { %1309 = vmatpush1.bf16.msra.mxu1 %v1979_v32  ;;  %v2050_v32 = vld [vmem:[#allocation10 + $0x28] sm:$0xff]  }
 0x187   :  { %1310 = vmatprep.subr.bf16.mxu1 %v1987_v39  ;;  %v2052_v39 = vld [vmem:[#allocation10 + $0x30] sm:$0xff]  }
 0x188   :  { %1385 = vmatpush1.bf16.msra.mxu0 %v1988_v35  ;;  %v2084_v9 = vpop.eup %2083  ;;  %v2054_v35 = vld [vmem:[#allocation10 + $0x38] sm:$0xff]  }
 0x189   :  { %1386 = vmatprep.subr.bf16.mxu0 %v1996_v41  ;;  %v465_v13 = vpack.c.bf16 %v2084_v9, %v2084_v9  ;;  %v2086_v18 = vpop.eup %2085 }
 0x18a   :  { %1311 = vmatpush1.bf16.msra.mxu1 %v1985_v36  ;;  %v469_v19 = vpack.c.bf16 %v2086_v18, %v2086_v18 }
 0x18b   :  { %1312 = vmatprep.subr.bf16.mxu1 %v1993_v43 }
 0x18c   :  { %1387 = vmatpush1.bf16.msra.mxu0 %v1994_v25  ;;  %v599_v25 = vld [vmem:[%s2422_s4] sm:$0x3] }
 0x18d   :  { %1388 = vmatprep.subr.bf16.mxu0 %v2002_v45  ;;  %v608_v45 = vrot.slane %v599_v25, %v117_v40 }
 0x18e   :  { %1313 = vmatpush1.bf16.msra.mxu1 %v1991_v44  ;;  %v604_v44 = vrot.slane %v599_v25, %v113_v38 }
 0x18f   :  { %1314 = vmatprep.subr.bf16.mxu1 %v1999_v48 }
 0x190   :  { %1389 = vmatpush1.bf16.msra.mxu0 %v2000_v49 }
 0x191   :  { %1390 = vmatprep.subr.bf16.mxu0 %v2008_v52 }
 0x192   :  { %1315 = vmatpush1.bf16.msra.mxu1 %v1997_v51 }
 0x193   :  { %1316 = vmatprep.subr.bf16.mxu1 %v2005_v53 }
 0x194   :  { %1391 = vmatpush1.bf16.msra.mxu0 %v2006_v54 }
 0x195   :  { %1392 = vmatprep.subr.bf16.mxu0 %v2014_v58 }
 0x196   :  { %1317 = vmatpush1.bf16.msra.mxu1 %v2003_v56 }
 0x197   :  { %1318 = vmatprep.subr.bf16.mxu1 %v2011_v59 }
 0x198   :  { %1393 = vmatpush1.bf16.msra.mxu0 %v2012_v60 }
 0x199   :  { %1394 = vmatprep.subr.bf16.mxu0 %v2020_v62 }
 0x19a   :  { %1319 = vmatpush1.bf16.msra.mxu1 %v2009_v61 }
 0x19b   :  { %1320 = vmatprep.subr.bf16.mxu1 %v2017_v63 }
 0x19c   :  { %1395 = vmatpush1.bf16.msra.mxu0 %v2018_v0 }
 0x19d   :  { %1396 = vmatprep.subr.bf16.mxu0 %v2026_v3 }
 0x19e   :  { %1321 = vmatpush1.bf16.msra.mxu1 %v2015_v2 }
 0x19f   :  { %1322 = vmatprep.subr.bf16.mxu1 %v2023_v4 }
 0x1a0   :  { %1397 = vmatpush1.bf16.msra.mxu0 %v2024_v6 }
 0x1a1   :  { %1398 = vmatprep.subr.bf16.mxu0 %v2029_v8 }
 0x1a2   :  { %1323 = vmatpush1.bf16.msra.mxu1 %v2021_v7 }
 0x1a3   :  { %1800 = vmatprep.subr.bf16.mxu1 %v2039_v20 }
 0x1a4   :  { %1399 = vmatpush1.bf16.msra.mxu0 %v2027_v11 }
 0x1a5   :  { %1325 = vmatmul.mubr.bf16.vlgmr.msra.gmra.mrb[0].mxu1 %v465_v13  ;;  %1400 = vmatprep.subr.bf16.mxu0 %v2032_v12 }
 0x1a6   :  { %1801 = vmatpush3.bf16.msra.mxu1 %v2040_v21 }
 0x1a7   :  { %1802 = vmatprep.subr.bf16.mxu1 %v2041_v22 }
 0x1a8   :  { %1401 = vmatpush1.bf16.msra.mxu0 %v2030_v14 }
 0x1a9   :  { %1402 = vmatprep.subr.bf16.mxu0 %v2035_v15 }
 0x1aa   :  { %1803 = vmatpush3.bf16.msra.mxu1 %v2042_v23 }
 0x1ab   :  { %1804 = vmatprep.subr.bf16.mxu1 %v2043_v24 }
 0x1ac   :  { %1403 = vmatpush1.bf16.msra.mxu0 %v2033_v57 }
 0x1ad   :  { %1404 = vmatprep.subr.bf16.mxu0 %v2038_v16 }
 0x1ae   :  { %1805 = vmatpush3.bf16.msra.mxu1 %v2044_v26 }
 0x1af   :  { %1806 = vmatprep.subr.bf16.mxu1 %v2045_v27 }
 0x1b0   :  { %1405 = vmatpush1.bf16.msra.mxu0 %v2036_v17 }
 0x1b2   :  { %1807 = vmatpush3.bf16.msra.mxu1 %v2046_v28 }
 0x1b3   :  { %1407 = vmatmul.mubr.bf16.vlgmr.msra.gmra.mrb[16].mxu0 %v469_v19  ;;  %1808 = vmatprep.subr.bf16.mxu1 %v2047_v29 }
 0x1b6   :  { %1809 = vmatpush3.bf16.msra.mxu1 %v2048_v30 }
 0x1b7   :  { %1810 = vmatprep.subr.bf16.mxu1 %v2049_v31 }
 0x1ba   :  { %1811 = vmatpush3.bf16.msra.mxu1 %v2050_v32 }
 0x1bb   :  { %1812 = vmatprep.subr.bf16.mxu1 %v2051_v33 }
 0x1be   :  { %1813 = vmatpush3.bf16.msra.mxu1 %v2052_v39 }
 0x1bf   :  { %1814 = vmatprep.subr.bf16.mxu1 %v2053_v34 }
 0x1c2   :  { %1815 = vmatpush3.bf16.msra.mxu1 %v2054_v35 }
 0x278   :  { %v1326_v36 = vpop.f32.mrb[0].mxu1 }
 0x279   :  { %v1328_v41 = vpop.f32.mrb[1].mxu1  ;;  %v1822_v46 = vadd.f32 %v1326_v36, %v604_v44 }
 0x27a   :  { %v1330_v42 = vpop.f32.mrb[2].mxu1  ;;  %v1824_v47 = vadd.f32 %v1328_v41, %v608_v45 }
 0x27b   :  { %v1331_v43 = vpop.f32.mrb[3].mxu1 }
 0x286   :  { %v1408_v48 = vpop.f32.mrb[16].mxu0 }
 0x287   :  { %v1823_v49 = vadd.f32 %v1822_v46, %v1408_v48  ;;  %v1410_v50 = vpop.f32.mrb[17].mxu0 }
 0x288   :  { %v1825_v51 = vadd.f32 %v1824_v47, %v1410_v50  ;;  %v1412_v52 = vpop.f32.mrb[18].mxu0 }
 0x289   :  { %v1415_v53 = vpack.c.bf16 %v1823_v49, %v1823_v49  ;;  %v1413_v54 = vpop.f32.mrb[19].mxu0 }
 0x28a   :  { %v1416_v55 = vpack.c.bf16 %v1825_v51, %v1825_v51 }
 0x28b   :  { %v1417_v56 = vsub.bf16 0, %v1415_v53 }
 0x28c   :  { %v1418_v58 = vsub.bf16 0, %v1416_v55 }
 0x28d   :  { %v1420_v59 = vmul.bf16 1069105081, %v1417_v56 }
 0x28e   :  { %v1423_v60 = vmul.bf16 1069105081, %v1418_v58 }
 0x28f   :  { %2087 = vpow.bf16 %v1420_v59 }
 0x290   :  { %2089 = vpow.bf16 %v1423_v60 }
 0x29a   :  { %v2088_v38 = vpop.eup %2087 }
 0x29b   :  { %v2090_v61 = vpop.eup %2089  ;;  %v1425_v37 = vunpack.c.l.bf16 %v2088_v38 }
 0x29c   :  { %v1426_v40 = vunpack.c.l.bf16 %v2090_v61 }
 0x29d   :  { %v1427_v62 = vadd.f32 1.0, %v1425_v37 }
 0x29e   :  { %v1428_v63 = vadd.f32 1.0, %v1426_v40 }
 0x29f   :  { %2091 = vrcp.f32 %v1427_v62 }
 0x2a0   :  { %2093 = vrcp.f32 %v1428_v63 }
 0x2a9   :  { %v2092_v0 = vpop.eup %2091 }
 0x2aa   :  { %v2094_v1 = vpop.eup %2093  ;;  %v1431_v3 = vpack.c.bf16 %v2092_v0, %v2092_v0 }
 0x2ab   :  { %v1432_v2 = vpack.c.bf16 %v2094_v1, %v2094_v1 }
 0x2ad   :  { %1600 = vmatprep.mubr.bf16.mxu1 %v1432_v2 }
 0x2ae   :  { %1601 = vmatmul.mubr.bf16.vlgmr.msra.gmra.mrb[4].mxu1 %v1431_v3 }
 0x381   :  { %v1816_v4 = vpop.f32.mrb[4].mxu1 }
 0x382   :  { %v1817_v6 = vpop.f32.mrb[5].mxu1 }
 0x383   :  { %v1818_v7 = vadd.f32 %v1817_v6, %v1816_v4  ;;  %v1819_v8 = vpop.f32.mrb[6].mxu1 }
 0x384   :  { %v1820_v9 = vpop.f32.mrb[7].mxu1 }
 0x385   :  { %v1603_v10 = vadd.f32 %v1818_v7, %v1783_v5 }
 0x387   :  { %v1608_v11 = vpack.c.bf16 %v1603_v10, %v1603_v10 }
 0x389   :  { %v1609_v12 = vsub.bf16 0, %v1608_v11 }
 0x38b   :  { %v1611_v13 = vmul.bf16 1069105081, %v1609_v12 }
 0x38d   :  { %2095 = vpow.bf16 %v1611_v13 }
 0x398   :  { %v2096_v14 = vpop.eup %2095 }
 0x399   :  { %v1613_v15 = vunpack.c.l.bf16 %v2096_v14 }
 0x39b   :  { %v1614_v57 = vadd.f32 1.0, %v1613_v15 }
 0x39d   :  { %2097 = vrcp.f32 %v1614_v57 }
 0x3a7   :  { %v2098_v16 = vpop.eup %2097 }
 0x3a8   :  { %v1616_v17 = vpack.c.bf16 %v2098_v16, %v2098_v16 }
 0x3aa   :  { %1617 = vst [vmem:[#allocation11] sm:$0xf] %v1616_v17 }
 0x3ab   :  { %2220 = shalt.err (!%p2217_p2)
}
 0x3ac   :  { %s2221_s21 = scalar_lea.hbm %s2425_s7, 64 }
 0x3ad   :  { %p2222_p3 = scmp.ne.s32.totalorder %s2425_s7, %s2221_s21  ;;  %p2225_p4 = scmp.lt.u32.totalorder %s2221_s21, %s2425_s7 }
 0x3af   :  { %p2227_p5 = pnand %p2225_p4, %p2222_p3 }
 0x3b1   :  { %2230 = shalt.err (!%p2227_p5)
}
 0x3b2   :  { %1627 = dma.vmem_to_hbm [thread:$0]  %s1625_s18, 64, %s2425_s7, [#allocation4]  }
 0x3b3   :  { %2237 = dma.done.wait [#allocation4], 64  }
 0x3b4   :  { %2238 = vsyncadd [#allocation4], 4294967232 }
 0x3b5   :  { %1631 = vsyncpa [#allocation3], 1 }
 0x3b6   :  { %1632 = vsyncpa [#allocation6], 1 }
 0x3b7   :  { %1633 = vsyncpa [#allocation9], 1 }
 0x3b8   :  { %1634 = vsyncpa [#allocation4], 1 }

</bundles_post_ra>
